<compile_context>
chip_gen: v5e
topology: v5e:2x2
jax: 0.10.0
libtpu: 0.0.40
codegen_flags: <defaults>
</compile_context>

<pallas_src>
import numpy as np
import jax
import jax.numpy as jnp
from jax import lax
from jax.experimental import pallas as pl
from jax.experimental.pallas import tpu as pltpu

KH = KW = 3
NUM_EXPERTS = 4
BN_EPS = 1e-5


def _make_fused_kernel(B, C, H, W, E, stage_dils, stage_dix):
    """Fused [CondConv2d -> BN -> ReLU] x (2 stages) x n_blocks kernel, (B*C, H*W) layout."""
    HW = H * W
    BC = B * C
    n_blocks = len(stage_dils) // 2
    hw_inv = 1.0 / float(HW)
    n_inv = 1.0 / float(B * H * W)

    def kernel(x_ref, rw_ref, rb_ref, ew_ref, g_ref, b_ref,
               samp_ref, rep_ref, rmask_ref, repl_ref, bdm_ref, chan_ref,
               mask_ref, *skip_refs):

        # Precomputed constants, resident in VMEM (loaded once, reused by all stages).
        samp = samp_ref[...]     # (BC, BC)   1 iff same sample            (routing sum)
        rep = rep_ref[...]       # (E, C*E)   expert replication matrix
        rmask = rmask_ref[...]   # (BC, C*E)  expert placement mask (co == co')
        repl = repl_ref[...]     # (9C, 9BC)  tap/in-channel replication matrix
        bdm = bdm_ref[...]       # (BC, 9BC)  same-sample block-diagonal mask
        chan = chan_ref[...]     # (BC, BC)   1 iff same channel           (BN sum)

        def cond_conv(x, s):
            """CondConv2d(dilation=d, padding=d) with per-sample mixed 3x3 kernels."""
            d = stage_dils[s]
            di = stage_dix[s]

            # routing: global average pool -> linear -> sigmoid (replicated per row)
            pooled = jnp.sum(x, axis=1, keepdims=True) * hw_inv             # (BC, 1)
            logits = jnp.dot(samp, pooled * rw_ref[s],
                             preferred_element_type=jnp.float32) + rb_ref[s]
            r = jax.nn.sigmoid(logits)                                      # (BC, E)

            # expert mix on the MXU: per-row 3x3xC kernels
            rbig = jnp.dot(r, rep, preferred_element_type=jnp.float32) * rmask   # (BC, C*E)
            wmat = jnp.dot(rbig, ew_ref[s],
                           preferred_element_type=jnp.float32)              # (BC, 9*C)

            # block-diagonal conv weight: one tiny matmul + mask (no lane concats)
            wbd = jnp.dot(wmat, repl,
                          preferred_element_type=jnp.float32) * bdm         # (BC, 9*BC)

            # 9 dilated taps via XLU lane rolls; wrap-around lanes are zeroed by the
            # precomputed per-dilation boundary masks.
            taps = []
            for kh in range(KH):
                for kw in range(KW):
                    shift = ((kh - 1) * W + (kw - 1)) * d
                    amt = (-shift) % HW
                    taps.append(x if amt == 0 else pltpu.roll(x, amt, 1))
            patches = jnp.concatenate(taps, axis=0) * mask_ref[di]          # (9*BC, HW)

            # single conv matmul on the MXU
            return jnp.dot(wbd, patches, preferred_element_type=jnp.float32)  # (BC, HW)

        def bn_relu(y, s):
            """BatchNorm2d (training-mode batch stats, biased variance) + ReLU."""
            # cross-sample per-channel sums via one matmul (result already replicated
            # to every row of that channel), then a lane reduction.
            tot = jnp.dot(chan, y, preferred_element_type=jnp.float32)       # (BC, HW)
            mean = jnp.sum(tot, axis=1, keepdims=True) * n_inv               # (BC, 1)
            cen = y - mean
            sqt = jnp.dot(chan, cen * cen, preferred_element_type=jnp.float32)
            var = jnp.sum(sqt, axis=1, keepdims=True) * n_inv
            yn = cen * lax.rsqrt(var + BN_EPS) * g_ref[s] + b_ref[s]
            return jnp.maximum(yn, 0.0)

        x = x_ref[...]
        s = 0
        for blk in range(n_blocks):
            y = bn_relu(cond_conv(x, s), s)
            s += 1
            z = cond_conv(y, s)
            x = bn_relu(x + z, s)
            s += 1
            skip_refs[blk][...] = x

    return kernel


def _prep_stage(rw, rb, ew, g, b, B, C, E):
    """Host-side parameter re-layout for the lane-dense kernel."""
    rw_t = jnp.tile(rw.T, (B, 1))                                   # (B*C, E)
    rb2 = rb.reshape(1, E)                                          # (1, E)
    # ew: (E, Cout, Cin, KH, KW) -> EW_big[co*E+e, (kh*KW+kw)*C + ci]
    ew_big = jnp.transpose(ew, (1, 0, 3, 4, 2)).reshape(C * E, KH * KW * C)
    g_col = jnp.tile(g, (B,)).reshape(B * C, 1)                     # (B*C, 1)
    b_col = jnp.tile(b, (B,)).reshape(B * C, 1)
    return rw_t, rb2, ew_big, g_col, b_col


def _build_constants(B, C, H, W, E, dils_unique):
    """Host-side 0/1 matrices + per-dilation boundary masks (passed once, stay in VMEM)."""
    BC, HW, K9 = B * C, H * W, KH * KW
    rr = np.arange(BC)
    # same-sample sum matrix (routing linear)
    samp = (rr[:, None] // C == rr[None, :] // C).astype(np.float32)          # (BC, BC)
    # expert replication: rep[e, co'*E + e'] = (e == e')
    cj = np.arange(C * E)
    rep = (cj[None, :] % E == np.arange(E)[:, None]).astype(np.float32)       # (E, C*E)
    # expert placement mask: rmask[b*C+co, co'*E+e] = (co == co')
    rmask = ((rr[:, None] % C) == (cj[None, :] // E)).astype(np.float32)      # (BC, C*E)
    # tap/in-channel replication: repl[t*C+ci, t'*BC+b'*C+ci'] = (t==t') & (ci==ci')
    ii = np.arange(K9 * C)
    jj = np.arange(K9 * BC)
    repl = ((ii[:, None] // C == jj[None, :] // BC) &
            (ii[:, None] % C == (jj[None, :] % BC) % C)).astype(np.float32)   # (9C, 9BC)
    # same-sample block-diagonal mask: bdm[b*C+co, t*BC+b'*C+ci] = (b == b')
    bdm = ((rr[:, None] // C) == ((jj[None, :] % BC) // C)).astype(np.float32)  # (BC, 9BC)
    # same-channel sum matrix (BatchNorm cross-sample stats)
    chan = (rr[:, None] % C == rr[None, :] % C).astype(np.float32)            # (BC, BC)
    # per-dilation boundary masks for the 9 rolled taps, pre-broadcast to (9*BC, HW)
    p = np.arange(HW)
    hh, ww = p // W, p % W
    mlist = []
    for d in dils_unique:
        taps = []
        for kh in range(KH):
            for kw in range(KW):
                dh, dw = (kh - 1) * d, (kw - 1) * d
                valid = ((hh + dh >= 0) & (hh + dh < H) &
                         (ww + dw >= 0) & (ww + dw < W)).astype(np.float32)
                taps.append(np.broadcast_to(valid[None, :], (BC, HW)))
        mlist.append(np.concatenate(taps, axis=0))
    masks = np.stack(mlist, axis=0)                                           # (n_dil, 9BC, HW)
    return tuple(jnp.asarray(a) for a in (samp, rep, rmask, repl, bdm, chan, masks))


def dilated_convolutions2(x_nchw, params, dilations):
    """Full forward: returns (out_nchw, [skip_nchw per block])."""
    B, C, H, W = x_nchw.shape
    E = NUM_EXPERTS
    BC, HW = B * C, H * W
    x2d = x_nchw.reshape(BC, HW)             # free reshape -> lane-dense layout

    prepped, stage_dils = [], []
    for p, d in zip(params, dilations):
        prepped.append(_prep_stage(p["rw1"], p["rb1"], p["ew1"], p["g1"], p["b1"], B, C, E))
        prepped.append(_prep_stage(p["rw2"], p["rb2"], p["ew2"], p["g2"], p["b2"], B, C, E))
        stage_dils += [d, d]

    rw_all = jnp.stack([sp[0] for sp in prepped])   # (S, B*C, E)
    rb_all = jnp.stack([sp[1] for sp in prepped])   # (S, 1, E)
    ew_all = jnp.stack([sp[2] for sp in prepped])   # (S, C*E, 9*C)
    g_all = jnp.stack([sp[3] for sp in prepped])    # (S, B*C, 1)
    b_all = jnp.stack([sp[4] for sp in prepped])    # (S, B*C, 1)

    dils_unique = list(dict.fromkeys(dilations))
    stage_dix = tuple(dils_unique.index(d) for d in stage_dils)
    consts = _build_constants(B, C, H, W, E, dils_unique)

    n_blocks = len(dilations)
    kernel = _make_fused_kernel(B, C, H, W, E, tuple(stage_dils), stage_dix)
    n_in = 6 + len(consts)

    skips2d = pl.pallas_call(
        kernel,
        out_shape=tuple(jax.ShapeDtypeStruct((BC, HW), jnp.float32)
                        for _ in range(n_blocks)),
        in_specs=[pl.BlockSpec(memory_space=pltpu.MemorySpace.VMEM) for _ in range(n_in)],
        out_specs=tuple(pl.BlockSpec(memory_space=pltpu.MemorySpace.VMEM)
                        for _ in range(n_blocks)),
    )(x2d, rw_all, rb_all, ew_all, g_all, b_all, *consts)

    skips = [s.reshape(B, C, H, W) for s in skips2d]
    return skips[-1], skips


def init_block_params(key, C, E):
    ks = jax.random.split(key, 6)
    wb = 1.0 / np.sqrt(C * KH * KW)               # conv fan-in bound (kaiming a=sqrt(5))
    lb = 1.0 / np.sqrt(C)                         # routing linear bound

    def uni(k, shape, bnd):
        return jax.random.uniform(k, shape, jnp.float32, -bnd, bnd)

    return {
        "ew1": uni(ks[0], (E, C, C, KH, KW), wb), "rw1": uni(ks[1], (E, C), lb),
        "rb1": uni(ks[2], (E,), lb),
        "ew2": uni(ks[3], (E, C, C, KH, KW), wb), "rw2": uni(ks[4], (E, C), lb),
        "rb2": uni(ks[5], (E,), lb),
        "g1": jnp.ones((C,), jnp.float32), "b1": jnp.zeros((C,), jnp.float32),
        "g2": jnp.ones((C,), jnp.float32), "b2": jnp.zeros((C,), jnp.float32),
    }


# ---------------- pure-JAX reference (for the numerical self-check) ----------------
def _ref_condconv(x, rw, rb, ew, d):
    B, C, H, W = x.shape
    pooled = jnp.mean(x, axis=(2, 3))                                        # (B, C)
    r = jax.nn.sigmoid(jnp.dot(pooled, rw.T, precision=lax.Precision.HIGHEST) + rb)
    w = jnp.einsum("be,eoikl->boikl", r, ew, precision=lax.Precision.HIGHEST)
    outs = []
    for b in range(B):
        outs.append(lax.conv_general_dilated(
            x[b:b + 1], w[b], window_strides=(1, 1),
            padding=[(d, d), (d, d)], rhs_dilation=(d, d),
            dimension_numbers=("NCHW", "OIHW", "NCHW"),
            precision=lax.Precision.HIGHEST)[0])
    return jnp.stack(outs, 0)


def _ref_bn_relu(y, g, b):
    m = jnp.mean(y, axis=(0, 2, 3), keepdims=True)
    v = jnp.mean((y - m) ** 2, axis=(0, 2, 3), keepdims=True)
    return jnp.maximum((y - m) / jnp.sqrt(v + BN_EPS) * g.reshape(1, -1, 1, 1)
                       + b.reshape(1, -1, 1, 1), 0.0)


def _ref_forward(x, params, dilations):
    skips = []
    for p, d in zip(params, dilations):
        y = _ref_bn_relu(_ref_condconv(x, p["rw1"], p["rb1"], p["ew1"], d), p["g1"], p["b1"])
        z = _ref_condconv(y, p["rw2"], p["rb2"], p["ew2"], d)
        x = _ref_bn_relu(x + z, p["g2"], p["b2"])
        skips.append(x)
    return x, skips


if __name__ == "__main__":
    B, C, H, W = 2, 4, 16, 16
    n_convolutions = 2
    dilations = [2 ** (k + 1) for k in range(n_convolutions)]     # [2, 4]

    key = jax.random.PRNGKey(0)
    kx, kp = jax.random.split(key)
    x = jax.random.normal(kx, (B, C, H, W), jnp.float32)
    params = [init_block_params(k, C, NUM_EXPERTS)
              for k in jax.random.split(kp, n_convolutions)]

    fwd = jax.jit(lambda xx: dilated_convolutions2(xx, params, dilations))
    out, skips = fwd(x)
    out = jax.block_until_ready(out)
    skips = [jax.block_until_ready(s) for s in skips]

    ref_out, ref_skips = _ref_forward(x, params, dilations)
    np.testing.assert_allclose(np.asarray(out), np.asarray(ref_out), rtol=2e-3, atol=2e-3)
    for a, b in zip(skips, ref_skips):
        np.testing.assert_allclose(np.asarray(a), np.asarray(b), rtol=2e-3, atol=2e-3)

    print("KERNEL_OK")
</pallas_src>

<mosaic_0001>
module attributes {stable_mosaic.version = 11 : i64} {
  func.func @kernel(%arg0: memref<8x256xf32, #tpu.memory_space<vmem>>, %arg1: memref<4x8x4xf32, #tpu.memory_space<vmem>>, %arg2: memref<4x1x4xf32, #tpu.memory_space<vmem>>, %arg3: memref<4x16x36xf32, #tpu.memory_space<vmem>>, %arg4: memref<4x8x1xf32, #tpu.memory_space<vmem>>, %arg5: memref<4x8x1xf32, #tpu.memory_space<vmem>>, %arg6: memref<8x8xf32, #tpu.memory_space<vmem>>, %arg7: memref<4x16xf32, #tpu.memory_space<vmem>>, %arg8: memref<8x16xf32, #tpu.memory_space<vmem>>, %arg9: memref<36x72xf32, #tpu.memory_space<vmem>>, %arg10: memref<8x72xf32, #tpu.memory_space<vmem>>, %arg11: memref<8x8xf32, #tpu.memory_space<vmem>>, %arg12: memref<2x72x256xf32, #tpu.memory_space<vmem>>, %arg13: memref<8x256xf32, #tpu.memory_space<vmem>>, %arg14: memref<8x256xf32, #tpu.memory_space<vmem>>) attributes {dimension_semantics = [], scalar_prefetch = 0 : i64, scratch_operands = 0 : i64, tpu.core_type = #tpu.core_type<tc>} {
    %c0 = arith.constant 0 : index
    %c0_0 = arith.constant 0 : index
    %0 = vector.load %arg6[%c0, %c0_0] : memref<8x8xf32, #tpu.memory_space<vmem>>, vector<8x8xf32>
    %c0_1 = arith.constant 0 : index
    %c0_2 = arith.constant 0 : index
    %1 = vector.load %arg7[%c0_1, %c0_2] : memref<4x16xf32, #tpu.memory_space<vmem>>, vector<4x16xf32>
    %c0_3 = arith.constant 0 : index
    %c0_4 = arith.constant 0 : index
    %2 = vector.load %arg8[%c0_3, %c0_4] : memref<8x16xf32, #tpu.memory_space<vmem>>, vector<8x16xf32>
    %c0_5 = arith.constant 0 : index
    %c0_6 = arith.constant 0 : index
    %3 = vector.load %arg9[%c0_5, %c0_6] : memref<36x72xf32, #tpu.memory_space<vmem>>, vector<36x72xf32>
    %c0_7 = arith.constant 0 : index
    %c0_8 = arith.constant 0 : index
    %4 = vector.load %arg10[%c0_7, %c0_8] : memref<8x72xf32, #tpu.memory_space<vmem>>, vector<8x72xf32>
    %c0_9 = arith.constant 0 : index
    %c0_10 = arith.constant 0 : index
    %5 = vector.load %arg11[%c0_9, %c0_10] : memref<8x8xf32, #tpu.memory_space<vmem>>, vector<8x8xf32>
    %c0_11 = arith.constant 0 : index
    %c0_12 = arith.constant 0 : index
    %6 = vector.load %arg0[%c0_11, %c0_12] : memref<8x256xf32, #tpu.memory_space<vmem>>, vector<8x256xf32>
    %cst = arith.constant dense<0.000000e+00> : vector<8xf32>
    %7 = vector.multi_reduction <add>, %6, %cst [1] : vector<8x256xf32> to vector<8xf32>
    %8 = vector.shape_cast %7 : vector<8xf32> to vector<8x1xf32>
    %cst_13 = arith.constant 3.906250e-03 : f32
    %9 = vector.broadcast %cst_13 : f32 to vector<8x1xf32>
    %10 = arith.mulf %8, %9 : vector<8x1xf32>
    %c0_14 = arith.constant 0 : index
    %c0_15 = arith.constant 0 : index
    %c0_16 = arith.constant 0 : index
    %11 = vector.load %arg1[%c0_14, %c0_15, %c0_16] : memref<4x8x4xf32, #tpu.memory_space<vmem>>, vector<1x8x4xf32>
    %12 = vector.shape_cast %11 : vector<1x8x4xf32> to vector<8x4xf32>
    %13 = vector.broadcast %10 : vector<8x1xf32> to vector<8x4xf32>
    %14 = arith.mulf %13, %12 : vector<8x4xf32>
    %cst_17 = arith.constant dense<0.000000e+00> : vector<8x4xf32>
    %15 = tpu.matmul %0, %14, %cst_17 {dimension_numbers = #tpu.dot_dimension_numbers<[1], [0], [0], [1], [0, 0, 1, 1], [], []>} : vector<8x8xf32>, vector<8x4xf32>, vector<8x4xf32> -> vector<8x4xf32>
    %c0_18 = arith.constant 0 : index
    %c0_19 = arith.constant 0 : index
    %c0_20 = arith.constant 0 : index
    %16 = vector.load %arg2[%c0_18, %c0_19, %c0_20] : memref<4x1x4xf32, #tpu.memory_space<vmem>>, vector<1x1x4xf32>
    %17 = vector.shape_cast %16 : vector<1x1x4xf32> to vector<1x4xf32>
    %18 = vector.broadcast %17 : vector<1x4xf32> to vector<8x4xf32>
    %19 = arith.addf %15, %18 : vector<8x4xf32>
    %20 = arith.negf %19 : vector<8x4xf32>
    %21 = math.exp %20 : vector<8x4xf32>
    %cst_21 = arith.constant 1.000000e+00 : f32
    %22 = vector.broadcast %cst_21 : f32 to vector<8x4xf32>
    %23 = arith.addf %22, %21 : vector<8x4xf32>
    %24 = arith.divf %22, %23 : vector<8x4xf32>
    %cst_22 = arith.constant dense<0.000000e+00> : vector<8x16xf32>
    %25 = tpu.matmul %24, %1, %cst_22 {dimension_numbers = #tpu.dot_dimension_numbers<[1], [0], [0], [1], [0, 0, 1, 1], [], []>} : vector<8x4xf32>, vector<4x16xf32>, vector<8x16xf32> -> vector<8x16xf32>
    %26 = arith.mulf %25, %2 : vector<8x16xf32>
    %c0_23 = arith.constant 0 : index
    %c0_24 = arith.constant 0 : index
    %c0_25 = arith.constant 0 : index
    %27 = vector.load %arg3[%c0_23, %c0_24, %c0_25] : memref<4x16x36xf32, #tpu.memory_space<vmem>>, vector<1x16x36xf32>
    %28 = vector.shape_cast %27 : vector<1x16x36xf32> to vector<16x36xf32>
    %cst_26 = arith.constant dense<0.000000e+00> : vector<8x36xf32>
    %29 = tpu.matmul %26, %28, %cst_26 {dimension_numbers = #tpu.dot_dimension_numbers<[1], [0], [0], [1], [0, 0, 1, 1], [], []>} : vector<8x16xf32>, vector<16x36xf32>, vector<8x36xf32> -> vector<8x36xf32>
    %cst_27 = arith.constant dense<0.000000e+00> : vector<8x72xf32>
    %30 = tpu.matmul %29, %3, %cst_27 {dimension_numbers = #tpu.dot_dimension_numbers<[1], [0], [0], [1], [0, 0, 1, 1], [], []>} : vector<8x36xf32>, vector<36x72xf32>, vector<8x72xf32> -> vector<8x72xf32>
    %31 = arith.mulf %30, %4 : vector<8x72xf32>
    %c34_i32 = arith.constant 34 : i32
    %32 = tpu.dynamic_rotate %6 by %c34_i32 dim 1 : vector<8x256xf32>, i32 -> vector<8x256xf32>
    %c32_i32 = arith.constant 32 : i32
    %33 = tpu.dynamic_rotate %6 by %c32_i32 dim 1 : vector<8x256xf32>, i32 -> vector<8x256xf32>
    %c30_i32 = arith.constant 30 : i32
    %34 = tpu.dynamic_rotate %6 by %c30_i32 dim 1 : vector<8x256xf32>, i32 -> vector<8x256xf32>
    %c2_i32 = arith.constant 2 : i32
    %35 = tpu.dynamic_rotate %6 by %c2_i32 dim 1 : vector<8x256xf32>, i32 -> vector<8x256xf32>
    %c254_i32 = arith.constant 254 : i32
    %36 = tpu.dynamic_rotate %6 by %c254_i32 dim 1 : vector<8x256xf32>, i32 -> vector<8x256xf32>
    %c226_i32 = arith.constant 226 : i32
    %37 = tpu.dynamic_rotate %6 by %c226_i32 dim 1 : vector<8x256xf32>, i32 -> vector<8x256xf32>
    %c224_i32 = arith.constant 224 : i32
    %38 = tpu.dynamic_rotate %6 by %c224_i32 dim 1 : vector<8x256xf32>, i32 -> vector<8x256xf32>
    %c222_i32 = arith.constant 222 : i32
    %39 = tpu.dynamic_rotate %6 by %c222_i32 dim 1 : vector<8x256xf32>, i32 -> vector<8x256xf32>
    %40 = tpu.concatenate %32, %33, %34, %35, %6, %36, %37, %38, %39 in 0 : vector<8x256xf32>, vector<8x256xf32>, vector<8x256xf32>, vector<8x256xf32>, vector<8x256xf32>, vector<8x256xf32>, vector<8x256xf32>, vector<8x256xf32>, vector<8x256xf32> -> vector<72x256xf32>
    %c0_28 = arith.constant 0 : index
    %c0_29 = arith.constant 0 : index
    %c0_30 = arith.constant 0 : index
    %41 = vector.load %arg12[%c0_28, %c0_29, %c0_30] : memref<2x72x256xf32, #tpu.memory_space<vmem>>, vector<1x72x256xf32>
    %42 = vector.shape_cast %41 : vector<1x72x256xf32> to vector<72x256xf32>
    %43 = arith.mulf %40, %42 : vector<72x256xf32>
    %cst_31 = arith.constant dense<0.000000e+00> : vector<8x256xf32>
    %44 = tpu.matmul %31, %43, %cst_31 {dimension_numbers = #tpu.dot_dimension_numbers<[1], [0], [0], [1], [0, 0, 1, 1], [], []>} : vector<8x72xf32>, vector<72x256xf32>, vector<8x256xf32> -> vector<8x256xf32>
    %cst_32 = arith.constant dense<0.000000e+00> : vector<8x256xf32>
    %45 = tpu.matmul %5, %44, %cst_32 {dimension_numbers = #tpu.dot_dimension_numbers<[1], [0], [0], [1], [0, 0, 1, 1], [], []>} : vector<8x8xf32>, vector<8x256xf32>, vector<8x256xf32> -> vector<8x256xf32>
    %cst_33 = arith.constant dense<0.000000e+00> : vector<8xf32>
    %46 = vector.multi_reduction <add>, %45, %cst_33 [1] : vector<8x256xf32> to vector<8xf32>
    %47 = vector.shape_cast %46 : vector<8xf32> to vector<8x1xf32>
    %cst_34 = arith.constant 0.001953125 : f32
    %48 = vector.broadcast %cst_34 : f32 to vector<8x1xf32>
    %49 = arith.mulf %47, %48 : vector<8x1xf32>
    %50 = vector.broadcast %49 : vector<8x1xf32> to vector<8x256xf32>
    %51 = arith.subf %44, %50 : vector<8x256xf32>
    %52 = arith.mulf %51, %51 : vector<8x256xf32>
    %cst_35 = arith.constant dense<0.000000e+00> : vector<8x256xf32>
    %53 = tpu.matmul %5, %52, %cst_35 {dimension_numbers = #tpu.dot_dimension_numbers<[1], [0], [0], [1], [0, 0, 1, 1], [], []>} : vector<8x8xf32>, vector<8x256xf32>, vector<8x256xf32> -> vector<8x256xf32>
    %cst_36 = arith.constant dense<0.000000e+00> : vector<8xf32>
    %54 = vector.multi_reduction <add>, %53, %cst_36 [1] : vector<8x256xf32> to vector<8xf32>
    %55 = vector.shape_cast %54 : vector<8xf32> to vector<8x1xf32>
    %cst_37 = arith.constant 0.001953125 : f32
    %56 = vector.broadcast %cst_37 : f32 to vector<8x1xf32>
    %57 = arith.mulf %55, %56 : vector<8x1xf32>
    %cst_38 = arith.constant 9.99999974E-6 : f32
    %58 = vector.broadcast %cst_38 : f32 to vector<8x1xf32>
    %59 = arith.addf %57, %58 : vector<8x1xf32>
    %60 = math.rsqrt %59 : vector<8x1xf32>
    %61 = vector.broadcast %60 : vector<8x1xf32> to vector<8x256xf32>
    %62 = arith.mulf %51, %61 : vector<8x256xf32>
    %c0_39 = arith.constant 0 : index
    %c0_40 = arith.constant 0 : index
    %c0_41 = arith.constant 0 : index
    %63 = vector.load %arg4[%c0_39, %c0_40, %c0_41] : memref<4x8x1xf32, #tpu.memory_space<vmem>>, vector<1x8x1xf32>
    %64 = vector.shape_cast %63 : vector<1x8x1xf32> to vector<8x1xf32>
    %65 = vector.broadcast %64 : vector<8x1xf32> to vector<8x256xf32>
    %66 = arith.mulf %62, %65 : vector<8x256xf32>
    %c0_42 = arith.constant 0 : index
    %c0_43 = arith.constant 0 : index
    %c0_44 = arith.constant 0 : index
    %67 = vector.load %arg5[%c0_42, %c0_43, %c0_44] : memref<4x8x1xf32, #tpu.memory_space<vmem>>, vector<1x8x1xf32>
    %68 = vector.shape_cast %67 : vector<1x8x1xf32> to vector<8x1xf32>
    %69 = vector.broadcast %68 : vector<8x1xf32> to vector<8x256xf32>
    %70 = arith.addf %66, %69 : vector<8x256xf32>
    %cst_45 = arith.constant 0.000000e+00 : f32
    %71 = vector.broadcast %cst_45 : f32 to vector<8x256xf32>
    %72 = arith.maximumf %70, %71 : vector<8x256xf32>
    %cst_46 = arith.constant dense<0.000000e+00> : vector<8xf32>
    %73 = vector.multi_reduction <add>, %72, %cst_46 [1] : vector<8x256xf32> to vector<8xf32>
    %74 = vector.shape_cast %73 : vector<8xf32> to vector<8x1xf32>
    %cst_47 = arith.constant 3.906250e-03 : f32
    %75 = vector.broadcast %cst_47 : f32 to vector<8x1xf32>
    %76 = arith.mulf %74, %75 : vector<8x1xf32>
    %c1 = arith.constant 1 : index
    %c0_48 = arith.constant 0 : index
    %c0_49 = arith.constant 0 : index
    %77 = vector.load %arg1[%c1, %c0_48, %c0_49] : memref<4x8x4xf32, #tpu.memory_space<vmem>>, vector<1x8x4xf32>
    %78 = vector.shape_cast %77 : vector<1x8x4xf32> to vector<8x4xf32>
    %79 = vector.broadcast %76 : vector<8x1xf32> to vector<8x4xf32>
    %80 = arith.mulf %79, %78 : vector<8x4xf32>
    %cst_50 = arith.constant dense<0.000000e+00> : vector<8x4xf32>
    %81 = tpu.matmul %0, %80, %cst_50 {dimension_numbers = #tpu.dot_dimension_numbers<[1], [0], [0], [1], [0, 0, 1, 1], [], []>} : vector<8x8xf32>, vector<8x4xf32>, vector<8x4xf32> -> vector<8x4xf32>
    %c1_51 = arith.constant 1 : index
    %c0_52 = arith.constant 0 : index
    %c0_53 = arith.constant 0 : index
    %82 = vector.load %arg2[%c1_51, %c0_52, %c0_53] : memref<4x1x4xf32, #tpu.memory_space<vmem>>, vector<1x1x4xf32>
    %83 = vector.shape_cast %82 : vector<1x1x4xf32> to vector<1x4xf32>
    %84 = vector.broadcast %83 : vector<1x4xf32> to vector<8x4xf32>
    %85 = arith.addf %81, %84 : vector<8x4xf32>
    %86 = arith.negf %85 : vector<8x4xf32>
    %87 = math.exp %86 : vector<8x4xf32>
    %cst_54 = arith.constant 1.000000e+00 : f32
    %88 = vector.broadcast %cst_54 : f32 to vector<8x4xf32>
    %89 = arith.addf %88, %87 : vector<8x4xf32>
    %90 = arith.divf %88, %89 : vector<8x4xf32>
    %cst_55 = arith.constant dense<0.000000e+00> : vector<8x16xf32>
    %91 = tpu.matmul %90, %1, %cst_55 {dimension_numbers = #tpu.dot_dimension_numbers<[1], [0], [0], [1], [0, 0, 1, 1], [], []>} : vector<8x4xf32>, vector<4x16xf32>, vector<8x16xf32> -> vector<8x16xf32>
    %92 = arith.mulf %91, %2 : vector<8x16xf32>
    %c1_56 = arith.constant 1 : index
    %c0_57 = arith.constant 0 : index
    %c0_58 = arith.constant 0 : index
    %93 = vector.load %arg3[%c1_56, %c0_57, %c0_58] : memref<4x16x36xf32, #tpu.memory_space<vmem>>, vector<1x16x36xf32>
    %94 = vector.shape_cast %93 : vector<1x16x36xf32> to vector<16x36xf32>
    %cst_59 = arith.constant dense<0.000000e+00> : vector<8x36xf32>
    %95 = tpu.matmul %92, %94, %cst_59 {dimension_numbers = #tpu.dot_dimension_numbers<[1], [0], [0], [1], [0, 0, 1, 1], [], []>} : vector<8x16xf32>, vector<16x36xf32>, vector<8x36xf32> -> vector<8x36xf32>
    %cst_60 = arith.constant dense<0.000000e+00> : vector<8x72xf32>
    %96 = tpu.matmul %95, %3, %cst_60 {dimension_numbers = #tpu.dot_dimension_numbers<[1], [0], [0], [1], [0, 0, 1, 1], [], []>} : vector<8x36xf32>, vector<36x72xf32>, vector<8x72xf32> -> vector<8x72xf32>
    %97 = arith.mulf %96, %4 : vector<8x72xf32>
    %c34_i32_61 = arith.constant 34 : i32
    %98 = tpu.dynamic_rotate %72 by %c34_i32_61 dim 1 : vector<8x256xf32>, i32 -> vector<8x256xf32>
    %c32_i32_62 = arith.constant 32 : i32
    %99 = tpu.dynamic_rotate %72 by %c32_i32_62 dim 1 : vector<8x256xf32>, i32 -> vector<8x256xf32>
    %c30_i32_63 = arith.constant 30 : i32
    %100 = tpu.dynamic_rotate %72 by %c30_i32_63 dim 1 : vector<8x256xf32>, i32 -> vector<8x256xf32>
    %c2_i32_64 = arith.constant 2 : i32
    %101 = tpu.dynamic_rotate %72 by %c2_i32_64 dim 1 : vector<8x256xf32>, i32 -> vector<8x256xf32>
    %c254_i32_65 = arith.constant 254 : i32
    %102 = tpu.dynamic_rotate %72 by %c254_i32_65 dim 1 : vector<8x256xf32>, i32 -> vector<8x256xf32>
    %c226_i32_66 = arith.constant 226 : i32
    %103 = tpu.dynamic_rotate %72 by %c226_i32_66 dim 1 : vector<8x256xf32>, i32 -> vector<8x256xf32>
    %c224_i32_67 = arith.constant 224 : i32
    %104 = tpu.dynamic_rotate %72 by %c224_i32_67 dim 1 : vector<8x256xf32>, i32 -> vector<8x256xf32>
    %c222_i32_68 = arith.constant 222 : i32
    %105 = tpu.dynamic_rotate %72 by %c222_i32_68 dim 1 : vector<8x256xf32>, i32 -> vector<8x256xf32>
    %106 = tpu.concatenate %98, %99, %100, %101, %72, %102, %103, %104, %105 in 0 : vector<8x256xf32>, vector<8x256xf32>, vector<8x256xf32>, vector<8x256xf32>, vector<8x256xf32>, vector<8x256xf32>, vector<8x256xf32>, vector<8x256xf32>, vector<8x256xf32> -> vector<72x256xf32>
    %c0_69 = arith.constant 0 : index
    %c0_70 = arith.constant 0 : index
    %c0_71 = arith.constant 0 : index
    %107 = vector.load %arg12[%c0_69, %c0_70, %c0_71] : memref<2x72x256xf32, #tpu.memory_space<vmem>>, vector<1x72x256xf32>
    %108 = vector.shape_cast %107 : vector<1x72x256xf32> to vector<72x256xf32>
    %109 = arith.mulf %106, %108 : vector<72x256xf32>
    %cst_72 = arith.constant dense<0.000000e+00> : vector<8x256xf32>
    %110 = tpu.matmul %97, %109, %cst_72 {dimension_numbers = #tpu.dot_dimension_numbers<[1], [0], [0], [1], [0, 0, 1, 1], [], []>} : vector<8x72xf32>, vector<72x256xf32>, vector<8x256xf32> -> vector<8x256xf32>
    %111 = arith.addf %6, %110 : vector<8x256xf32>
    %cst_73 = arith.constant dense<0.000000e+00> : vector<8x256xf32>
    %112 = tpu.matmul %5, %111, %cst_73 {dimension_numbers = #tpu.dot_dimension_numbers<[1], [0], [0], [1], [0, 0, 1, 1], [], []>} : vector<8x8xf32>, vector<8x256xf32>, vector<8x256xf32> -> vector<8x256xf32>
    %cst_74 = arith.constant dense<0.000000e+00> : vector<8xf32>
    %113 = vector.multi_reduction <add>, %112, %cst_74 [1] : vector<8x256xf32> to vector<8xf32>
    %114 = vector.shape_cast %113 : vector<8xf32> to vector<8x1xf32>
    %cst_75 = arith.constant 0.001953125 : f32
    %115 = vector.broadcast %cst_75 : f32 to vector<8x1xf32>
    %116 = arith.mulf %114, %115 : vector<8x1xf32>
    %117 = vector.broadcast %116 : vector<8x1xf32> to vector<8x256xf32>
    %118 = arith.subf %111, %117 : vector<8x256xf32>
    %119 = arith.mulf %118, %118 : vector<8x256xf32>
    %cst_76 = arith.constant dense<0.000000e+00> : vector<8x256xf32>
    %120 = tpu.matmul %5, %119, %cst_76 {dimension_numbers = #tpu.dot_dimension_numbers<[1], [0], [0], [1], [0, 0, 1, 1], [], []>} : vector<8x8xf32>, vector<8x256xf32>, vector<8x256xf32> -> vector<8x256xf32>
    %cst_77 = arith.constant dense<0.000000e+00> : vector<8xf32>
    %121 = vector.multi_reduction <add>, %120, %cst_77 [1] : vector<8x256xf32> to vector<8xf32>
    %122 = vector.shape_cast %121 : vector<8xf32> to vector<8x1xf32>
    %cst_78 = arith.constant 0.001953125 : f32
    %123 = vector.broadcast %cst_78 : f32 to vector<8x1xf32>
    %124 = arith.mulf %122, %123 : vector<8x1xf32>
    %cst_79 = arith.constant 9.99999974E-6 : f32
    %125 = vector.broadcast %cst_79 : f32 to vector<8x1xf32>
    %126 = arith.addf %124, %125 : vector<8x1xf32>
    %127 = math.rsqrt %126 : vector<8x1xf32>
    %128 = vector.broadcast %127 : vector<8x1xf32> to vector<8x256xf32>
    %129 = arith.mulf %118, %128 : vector<8x256xf32>
    %c1_80 = arith.constant 1 : index
    %c0_81 = arith.constant 0 : index
    %c0_82 = arith.constant 0 : index
    %130 = vector.load %arg4[%c1_80, %c0_81, %c0_82] : memref<4x8x1xf32, #tpu.memory_space<vmem>>, vector<1x8x1xf32>
    %131 = vector.shape_cast %130 : vector<1x8x1xf32> to vector<8x1xf32>
    %132 = vector.broadcast %131 : vector<8x1xf32> to vector<8x256xf32>
    %133 = arith.mulf %129, %132 : vector<8x256xf32>
    %c1_83 = arith.constant 1 : index
    %c0_84 = arith.constant 0 : index
    %c0_85 = arith.constant 0 : index
    %134 = vector.load %arg5[%c1_83, %c0_84, %c0_85] : memref<4x8x1xf32, #tpu.memory_space<vmem>>, vector<1x8x1xf32>
    %135 = vector.shape_cast %134 : vector<1x8x1xf32> to vector<8x1xf32>
    %136 = vector.broadcast %135 : vector<8x1xf32> to vector<8x256xf32>
    %137 = arith.addf %133, %136 : vector<8x256xf32>
    %cst_86 = arith.constant 0.000000e+00 : f32
    %138 = vector.broadcast %cst_86 : f32 to vector<8x256xf32>
    %139 = arith.maximumf %137, %138 : vector<8x256xf32>
    %c0_87 = arith.constant 0 : index
    %c0_88 = arith.constant 0 : index
    %140 = vector.load %arg13[%c0_87, %c0_88] : memref<8x256xf32, #tpu.memory_space<vmem>>, vector<8x256xf32>
    tpu.vector_store %arg13[%c0_87, %c0_88], %139 {strides = array<i32>} : memref<8x256xf32, #tpu.memory_space<vmem>>, vector<8x256xf32>,
    %cst_89 = arith.constant dense<0.000000e+00> : vector<8xf32>
    %141 = vector.multi_reduction <add>, %139, %cst_89 [1] : vector<8x256xf32> to vector<8xf32>
    %142 = vector.shape_cast %141 : vector<8xf32> to vector<8x1xf32>
    %cst_90 = arith.constant 3.906250e-03 : f32
    %143 = vector.broadcast %cst_90 : f32 to vector<8x1xf32>
    %144 = arith.mulf %142, %143 : vector<8x1xf32>
    %c2 = arith.constant 2 : index
    %c0_91 = arith.constant 0 : index
    %c0_92 = arith.constant 0 : index
    %145 = vector.load %arg1[%c2, %c0_91, %c0_92] : memref<4x8x4xf32, #tpu.memory_space<vmem>>, vector<1x8x4xf32>
    %146 = vector.shape_cast %145 : vector<1x8x4xf32> to vector<8x4xf32>
    %147 = vector.broadcast %144 : vector<8x1xf32> to vector<8x4xf32>
    %148 = arith.mulf %147, %146 : vector<8x4xf32>
    %cst_93 = arith.constant dense<0.000000e+00> : vector<8x4xf32>
    %149 = tpu.matmul %0, %148, %cst_93 {dimension_numbers = #tpu.dot_dimension_numbers<[1], [0], [0], [1], [0, 0, 1, 1], [], []>} : vector<8x8xf32>, vector<8x4xf32>, vector<8x4xf32> -> vector<8x4xf32>
    %c2_94 = arith.constant 2 : index
    %c0_95 = arith.constant 0 : index
    %c0_96 = arith.constant 0 : index
    %150 = vector.load %arg2[%c2_94, %c0_95, %c0_96] : memref<4x1x4xf32, #tpu.memory_space<vmem>>, vector<1x1x4xf32>
    %151 = vector.shape_cast %150 : vector<1x1x4xf32> to vector<1x4xf32>
    %152 = vector.broadcast %151 : vector<1x4xf32> to vector<8x4xf32>
    %153 = arith.addf %149, %152 : vector<8x4xf32>
    %154 = arith.negf %153 : vector<8x4xf32>
    %155 = math.exp %154 : vector<8x4xf32>
    %cst_97 = arith.constant 1.000000e+00 : f32
    %156 = vector.broadcast %cst_97 : f32 to vector<8x4xf32>
    %157 = arith.addf %156, %155 : vector<8x4xf32>
    %158 = arith.divf %156, %157 : vector<8x4xf32>
    %cst_98 = arith.constant dense<0.000000e+00> : vector<8x16xf32>
    %159 = tpu.matmul %158, %1, %cst_98 {dimension_numbers = #tpu.dot_dimension_numbers<[1], [0], [0], [1], [0, 0, 1, 1], [], []>} : vector<8x4xf32>, vector<4x16xf32>, vector<8x16xf32> -> vector<8x16xf32>
    %160 = arith.mulf %159, %2 : vector<8x16xf32>
    %c2_99 = arith.constant 2 : index
    %c0_100 = arith.constant 0 : index
    %c0_101 = arith.constant 0 : index
    %161 = vector.load %arg3[%c2_99, %c0_100, %c0_101] : memref<4x16x36xf32, #tpu.memory_space<vmem>>, vector<1x16x36xf32>
    %162 = vector.shape_cast %161 : vector<1x16x36xf32> to vector<16x36xf32>
    %cst_102 = arith.constant dense<0.000000e+00> : vector<8x36xf32>
    %163 = tpu.matmul %160, %162, %cst_102 {dimension_numbers = #tpu.dot_dimension_numbers<[1], [0], [0], [1], [0, 0, 1, 1], [], []>} : vector<8x16xf32>, vector<16x36xf32>, vector<8x36xf32> -> vector<8x36xf32>
    %cst_103 = arith.constant dense<0.000000e+00> : vector<8x72xf32>
    %164 = tpu.matmul %163, %3, %cst_103 {dimension_numbers = #tpu.dot_dimension_numbers<[1], [0], [0], [1], [0, 0, 1, 1], [], []>} : vector<8x36xf32>, vector<36x72xf32>, vector<8x72xf32> -> vector<8x72xf32>
    %165 = arith.mulf %164, %4 : vector<8x72xf32>
    %c68_i32 = arith.constant 68 : i32
    %166 = tpu.dynamic_rotate %139 by %c68_i32 dim 1 : vector<8x256xf32>, i32 -> vector<8x256xf32>
    %c64_i32 = arith.constant 64 : i32
    %167 = tpu.dynamic_rotate %139 by %c64_i32 dim 1 : vector<8x256xf32>, i32 -> vector<8x256xf32>
    %c60_i32 = arith.constant 60 : i32
    %168 = tpu.dynamic_rotate %139 by %c60_i32 dim 1 : vector<8x256xf32>, i32 -> vector<8x256xf32>
    %c4_i32 = arith.constant 4 : i32
    %169 = tpu.dynamic_rotate %139 by %c4_i32 dim 1 : vector<8x256xf32>, i32 -> vector<8x256xf32>
    %c252_i32 = arith.constant 252 : i32
    %170 = tpu.dynamic_rotate %139 by %c252_i32 dim 1 : vector<8x256xf32>, i32 -> vector<8x256xf32>
    %c196_i32 = arith.constant 196 : i32
    %171 = tpu.dynamic_rotate %139 by %c196_i32 dim 1 : vector<8x256xf32>, i32 -> vector<8x256xf32>
    %c192_i32 = arith.constant 192 : i32
    %172 = tpu.dynamic_rotate %139 by %c192_i32 dim 1 : vector<8x256xf32>, i32 -> vector<8x256xf32>
    %c188_i32 = arith.constant 188 : i32
    %173 = tpu.dynamic_rotate %139 by %c188_i32 dim 1 : vector<8x256xf32>, i32 -> vector<8x256xf32>
    %174 = tpu.concatenate %166, %167, %168, %169, %139, %170, %171, %172, %173 in 0 : vector<8x256xf32>, vector<8x256xf32>, vector<8x256xf32>, vector<8x256xf32>, vector<8x256xf32>, vector<8x256xf32>, vector<8x256xf32>, vector<8x256xf32>, vector<8x256xf32> -> vector<72x256xf32>
    %c1_104 = arith.constant 1 : index
    %c0_105 = arith.constant 0 : index
    %c0_106 = arith.constant 0 : index
    %175 = vector.load %arg12[%c1_104, %c0_105, %c0_106] : memref<2x72x256xf32, #tpu.memory_space<vmem>>, vector<1x72x256xf32>
    %176 = vector.shape_cast %175 : vector<1x72x256xf32> to vector<72x256xf32>
    %177 = arith.mulf %174, %176 : vector<72x256xf32>
    %cst_107 = arith.constant dense<0.000000e+00> : vector<8x256xf32>
    %178 = tpu.matmul %165, %177, %cst_107 {dimension_numbers = #tpu.dot_dimension_numbers<[1], [0], [0], [1], [0, 0, 1, 1], [], []>} : vector<8x72xf32>, vector<72x256xf32>, vector<8x256xf32> -> vector<8x256xf32>
    %cst_108 = arith.constant dense<0.000000e+00> : vector<8x256xf32>
    %179 = tpu.matmul %5, %178, %cst_108 {dimension_numbers = #tpu.dot_dimension_numbers<[1], [0], [0], [1], [0, 0, 1, 1], [], []>} : vector<8x8xf32>, vector<8x256xf32>, vector<8x256xf32> -> vector<8x256xf32>
    %cst_109 = arith.constant dense<0.000000e+00> : vector<8xf32>
    %180 = vector.multi_reduction <add>, %179, %cst_109 [1] : vector<8x256xf32> to vector<8xf32>
    %181 = vector.shape_cast %180 : vector<8xf32> to vector<8x1xf32>
    %cst_110 = arith.constant 0.001953125 : f32
    %182 = vector.broadcast %cst_110 : f32 to vector<8x1xf32>
    %183 = arith.mulf %181, %182 : vector<8x1xf32>
    %184 = vector.broadcast %183 : vector<8x1xf32> to vector<8x256xf32>
    %185 = arith.subf %178, %184 : vector<8x256xf32>
    %186 = arith.mulf %185, %185 : vector<8x256xf32>
    %cst_111 = arith.constant dense<0.000000e+00> : vector<8x256xf32>
    %187 = tpu.matmul %5, %186, %cst_111 {dimension_numbers = #tpu.dot_dimension_numbers<[1], [0], [0], [1], [0, 0, 1, 1], [], []>} : vector<8x8xf32>, vector<8x256xf32>, vector<8x256xf32> -> vector<8x256xf32>
    %cst_112 = arith.constant dense<0.000000e+00> : vector<8xf32>
    %188 = vector.multi_reduction <add>, %187, %cst_112 [1] : vector<8x256xf32> to vector<8xf32>
    %189 = vector.shape_cast %188 : vector<8xf32> to vector<8x1xf32>
    %cst_113 = arith.constant 0.001953125 : f32
    %190 = vector.broadcast %cst_113 : f32 to vector<8x1xf32>
    %191 = arith.mulf %189, %190 : vector<8x1xf32>
    %cst_114 = arith.constant 9.99999974E-6 : f32
    %192 = vector.broadcast %cst_114 : f32 to vector<8x1xf32>
    %193 = arith.addf %191, %192 : vector<8x1xf32>
    %194 = math.rsqrt %193 : vector<8x1xf32>
    %195 = vector.broadcast %194 : vector<8x1xf32> to vector<8x256xf32>
    %196 = arith.mulf %185, %195 : vector<8x256xf32>
    %c2_115 = arith.constant 2 : index
    %c0_116 = arith.constant 0 : index
    %c0_117 = arith.constant 0 : index
    %197 = vector.load %arg4[%c2_115, %c0_116, %c0_117] : memref<4x8x1xf32, #tpu.memory_space<vmem>>, vector<1x8x1xf32>
    %198 = vector.shape_cast %197 : vector<1x8x1xf32> to vector<8x1xf32>
    %199 = vector.broadcast %198 : vector<8x1xf32> to vector<8x256xf32>
    %200 = arith.mulf %196, %199 : vector<8x256xf32>
    %c2_118 = arith.constant 2 : index
    %c0_119 = arith.constant 0 : index
    %c0_120 = arith.constant 0 : index
    %201 = vector.load %arg5[%c2_118, %c0_119, %c0_120] : memref<4x8x1xf32, #tpu.memory_space<vmem>>, vector<1x8x1xf32>
    %202 = vector.shape_cast %201 : vector<1x8x1xf32> to vector<8x1xf32>
    %203 = vector.broadcast %202 : vector<8x1xf32> to vector<8x256xf32>
    %204 = arith.addf %200, %203 : vector<8x256xf32>
    %cst_121 = arith.constant 0.000000e+00 : f32
    %205 = vector.broadcast %cst_121 : f32 to vector<8x256xf32>
    %206 = arith.maximumf %204, %205 : vector<8x256xf32>
    %cst_122 = arith.constant dense<0.000000e+00> : vector<8xf32>
    %207 = vector.multi_reduction <add>, %206, %cst_122 [1] : vector<8x256xf32> to vector<8xf32>
    %208 = vector.shape_cast %207 : vector<8xf32> to vector<8x1xf32>
    %cst_123 = arith.constant 3.906250e-03 : f32
    %209 = vector.broadcast %cst_123 : f32 to vector<8x1xf32>
    %210 = arith.mulf %208, %209 : vector<8x1xf32>
    %c3 = arith.constant 3 : index
    %c0_124 = arith.constant 0 : index
    %c0_125 = arith.constant 0 : index
    %211 = vector.load %arg1[%c3, %c0_124, %c0_125] : memref<4x8x4xf32, #tpu.memory_space<vmem>>, vector<1x8x4xf32>
    %212 = vector.shape_cast %211 : vector<1x8x4xf32> to vector<8x4xf32>
    %213 = vector.broadcast %210 : vector<8x1xf32> to vector<8x4xf32>
    %214 = arith.mulf %213, %212 : vector<8x4xf32>
    %cst_126 = arith.constant dense<0.000000e+00> : vector<8x4xf32>
    %215 = tpu.matmul %0, %214, %cst_126 {dimension_numbers = #tpu.dot_dimension_numbers<[1], [0], [0], [1], [0, 0, 1, 1], [], []>} : vector<8x8xf32>, vector<8x4xf32>, vector<8x4xf32> -> vector<8x4xf32>
    %c3_127 = arith.constant 3 : index
    %c0_128 = arith.constant 0 : index
    %c0_129 = arith.constant 0 : index
    %216 = vector.load %arg2[%c3_127, %c0_128, %c0_129] : memref<4x1x4xf32, #tpu.memory_space<vmem>>, vector<1x1x4xf32>
    %217 = vector.shape_cast %216 : vector<1x1x4xf32> to vector<1x4xf32>
    %218 = vector.broadcast %217 : vector<1x4xf32> to vector<8x4xf32>
    %219 = arith.addf %215, %218 : vector<8x4xf32>
    %220 = arith.negf %219 : vector<8x4xf32>
    %221 = math.exp %220 : vector<8x4xf32>
    %cst_130 = arith.constant 1.000000e+00 : f32
    %222 = vector.broadcast %cst_130 : f32 to vector<8x4xf32>
    %223 = arith.addf %222, %221 : vector<8x4xf32>
    %224 = arith.divf %222, %223 : vector<8x4xf32>
    %cst_131 = arith.constant dense<0.000000e+00> : vector<8x16xf32>
    %225 = tpu.matmul %224, %1, %cst_131 {dimension_numbers = #tpu.dot_dimension_numbers<[1], [0], [0], [1], [0, 0, 1, 1], [], []>} : vector<8x4xf32>, vector<4x16xf32>, vector<8x16xf32> -> vector<8x16xf32>
    %226 = arith.mulf %225, %2 : vector<8x16xf32>
    %c3_132 = arith.constant 3 : index
    %c0_133 = arith.constant 0 : index
    %c0_134 = arith.constant 0 : index
    %227 = vector.load %arg3[%c3_132, %c0_133, %c0_134] : memref<4x16x36xf32, #tpu.memory_space<vmem>>, vector<1x16x36xf32>
    %228 = vector.shape_cast %227 : vector<1x16x36xf32> to vector<16x36xf32>
    %cst_135 = arith.constant dense<0.000000e+00> : vector<8x36xf32>
    %229 = tpu.matmul %226, %228, %cst_135 {dimension_numbers = #tpu.dot_dimension_numbers<[1], [0], [0], [1], [0, 0, 1, 1], [], []>} : vector<8x16xf32>, vector<16x36xf32>, vector<8x36xf32> -> vector<8x36xf32>
    %cst_136 = arith.constant dense<0.000000e+00> : vector<8x72xf32>
    %230 = tpu.matmul %229, %3, %cst_136 {dimension_numbers = #tpu.dot_dimension_numbers<[1], [0], [0], [1], [0, 0, 1, 1], [], []>} : vector<8x36xf32>, vector<36x72xf32>, vector<8x72xf32> -> vector<8x72xf32>
    %231 = arith.mulf %230, %4 : vector<8x72xf32>
    %c68_i32_137 = arith.constant 68 : i32
    %232 = tpu.dynamic_rotate %206 by %c68_i32_137 dim 1 : vector<8x256xf32>, i32 -> vector<8x256xf32>
    %c64_i32_138 = arith.constant 64 : i32
    %233 = tpu.dynamic_rotate %206 by %c64_i32_138 dim 1 : vector<8x256xf32>, i32 -> vector<8x256xf32>
    %c60_i32_139 = arith.constant 60 : i32
    %234 = tpu.dynamic_rotate %206 by %c60_i32_139 dim 1 : vector<8x256xf32>, i32 -> vector<8x256xf32>
    %c4_i32_140 = arith.constant 4 : i32
    %235 = tpu.dynamic_rotate %206 by %c4_i32_140 dim 1 : vector<8x256xf32>, i32 -> vector<8x256xf32>
    %c252_i32_141 = arith.constant 252 : i32
    %236 = tpu.dynamic_rotate %206 by %c252_i32_141 dim 1 : vector<8x256xf32>, i32 -> vector<8x256xf32>
    %c196_i32_142 = arith.constant 196 : i32
    %237 = tpu.dynamic_rotate %206 by %c196_i32_142 dim 1 : vector<8x256xf32>, i32 -> vector<8x256xf32>
    %c192_i32_143 = arith.constant 192 : i32
    %238 = tpu.dynamic_rotate %206 by %c192_i32_143 dim 1 : vector<8x256xf32>, i32 -> vector<8x256xf32>
    %c188_i32_144 = arith.constant 188 : i32
    %239 = tpu.dynamic_rotate %206 by %c188_i32_144 dim 1 : vector<8x256xf32>, i32 -> vector<8x256xf32>
    %240 = tpu.concatenate %232, %233, %234, %235, %206, %236, %237, %238, %239 in 0 : vector<8x256xf32>, vector<8x256xf32>, vector<8x256xf32>, vector<8x256xf32>, vector<8x256xf32>, vector<8x256xf32>, vector<8x256xf32>, vector<8x256xf32>, vector<8x256xf32> -> vector<72x256xf32>
    %c1_145 = arith.constant 1 : index
    %c0_146 = arith.constant 0 : index
    %c0_147 = arith.constant 0 : index
    %241 = vector.load %arg12[%c1_145, %c0_146, %c0_147] : memref<2x72x256xf32, #tpu.memory_space<vmem>>, vector<1x72x256xf32>
    %242 = vector.shape_cast %241 : vector<1x72x256xf32> to vector<72x256xf32>
    %243 = arith.mulf %240, %242 : vector<72x256xf32>
    %cst_148 = arith.constant dense<0.000000e+00> : vector<8x256xf32>
    %244 = tpu.matmul %231, %243, %cst_148 {dimension_numbers = #tpu.dot_dimension_numbers<[1], [0], [0], [1], [0, 0, 1, 1], [], []>} : vector<8x72xf32>, vector<72x256xf32>, vector<8x256xf32> -> vector<8x256xf32>
    %245 = arith.addf %139, %244 : vector<8x256xf32>
    %cst_149 = arith.constant dense<0.000000e+00> : vector<8x256xf32>
    %246 = tpu.matmul %5, %245, %cst_149 {dimension_numbers = #tpu.dot_dimension_numbers<[1], [0], [0], [1], [0, 0, 1, 1], [], []>} : vector<8x8xf32>, vector<8x256xf32>, vector<8x256xf32> -> vector<8x256xf32>
    %cst_150 = arith.constant dense<0.000000e+00> : vector<8xf32>
    %247 = vector.multi_reduction <add>, %246, %cst_150 [1] : vector<8x256xf32> to vector<8xf32>
    %248 = vector.shape_cast %247 : vector<8xf32> to vector<8x1xf32>
    %cst_151 = arith.constant 0.001953125 : f32
    %249 = vector.broadcast %cst_151 : f32 to vector<8x1xf32>
    %250 = arith.mulf %248, %249 : vector<8x1xf32>
    %251 = vector.broadcast %250 : vector<8x1xf32> to vector<8x256xf32>
    %252 = arith.subf %245, %251 : vector<8x256xf32>
    %253 = arith.mulf %252, %252 : vector<8x256xf32>
    %cst_152 = arith.constant dense<0.000000e+00> : vector<8x256xf32>
    %254 = tpu.matmul %5, %253, %cst_152 {dimension_numbers = #tpu.dot_dimension_numbers<[1], [0], [0], [1], [0, 0, 1, 1], [], []>} : vector<8x8xf32>, vector<8x256xf32>, vector<8x256xf32> -> vector<8x256xf32>
    %cst_153 = arith.constant dense<0.000000e+00> : vector<8xf32>
    %255 = vector.multi_reduction <add>, %254, %cst_153 [1] : vector<8x256xf32> to vector<8xf32>
    %256 = vector.shape_cast %255 : vector<8xf32> to vector<8x1xf32>
    %cst_154 = arith.constant 0.001953125 : f32
    %257 = vector.broadcast %cst_154 : f32 to vector<8x1xf32>
    %258 = arith.mulf %256, %257 : vector<8x1xf32>
    %cst_155 = arith.constant 9.99999974E-6 : f32
    %259 = vector.broadcast %cst_155 : f32 to vector<8x1xf32>
    %260 = arith.addf %258, %259 : vector<8x1xf32>
    %261 = math.rsqrt %260 : vector<8x1xf32>
    %262 = vector.broadcast %261 : vector<8x1xf32> to vector<8x256xf32>
    %263 = arith.mulf %252, %262 : vector<8x256xf32>
    %c3_156 = arith.constant 3 : index
    %c0_157 = arith.constant 0 : index
    %c0_158 = arith.constant 0 : index
    %264 = vector.load %arg4[%c3_156, %c0_157, %c0_158] : memref<4x8x1xf32, #tpu.memory_space<vmem>>, vector<1x8x1xf32>
    %265 = vector.shape_cast %264 : vector<1x8x1xf32> to vector<8x1xf32>
    %266 = vector.broadcast %265 : vector<8x1xf32> to vector<8x256xf32>
    %267 = arith.mulf %263, %266 : vector<8x256xf32>
    %c3_159 = arith.constant 3 : index
    %c0_160 = arith.constant 0 : index
    %c0_161 = arith.constant 0 : index
    %268 = vector.load %arg5[%c3_159, %c0_160, %c0_161] : memref<4x8x1xf32, #tpu.memory_space<vmem>>, vector<1x8x1xf32>
    %269 = vector.shape_cast %268 : vector<1x8x1xf32> to vector<8x1xf32>
    %270 = vector.broadcast %269 : vector<8x1xf32> to vector<8x256xf32>
    %271 = arith.addf %267, %270 : vector<8x256xf32>
    %cst_162 = arith.constant 0.000000e+00 : f32
    %272 = vector.broadcast %cst_162 : f32 to vector<8x256xf32>
    %273 = arith.maximumf %271, %272 : vector<8x256xf32>
    %c0_163 = arith.constant 0 : index
    %c0_164 = arith.constant 0 : index
    %274 = vector.load %arg14[%c0_163, %c0_164] : memref<8x256xf32, #tpu.memory_space<vmem>>, vector<8x256xf32>
    tpu.vector_store %arg14[%c0_163, %c0_164], %273 {strides = array<i32>} : memref<8x256xf32, #tpu.memory_space<vmem>>, vector<8x256xf32>,
    return
  }
}

</mosaic_0001>

<bundles_post_ra>
// kernel: _lambda_.1
= control target key start
LH: loop header
LB: loop body
LE: loop exit
PB: predicated region body
PF: predicated region fallthrough
CT: control target
= control target key end

     0   :  { %20 = vsyncpa [#allocation3], 0  ;;  %s1710_s16 = smov [#allocation2]   ;;  %s1711_s18 = smov 256   ;;  %s2429_s0 = inlined_call_operand.vmem [shape: f32[8,256], index: 0, kind: input, shape index: {}]   ;;  %s2430_s1 = inlined_call_operand.vmem [shape: f32[4,8,4], index: 1, kind: input, shape index: {}]   ;;  %s2431_s2 = inlined_call_operand.vmem [shape: f32[4,1,4], index: 2, kind: input, shape index: {}]   ;;  %s2432_s3 = inlined_call_operand.vmem [shape: f32[4,16,36], index: 3, kind: input, shape index: {}]   ;;  %s2433_s4 = inlined_call_operand.vmem [shape: f32[4,8,1], index: 4, kind: input, shape index: {}]   ;;  %s2434_s5 = inlined_call_operand.vmem [shape: f32[4,8,1], index: 5, kind: input, shape index: {}]   ;;  %s2435_s6 = inlined_call_operand.vmem [shape: f32[8,8], index: 6, kind: input, shape index: {}]   ;;  %s2436_s7 = inlined_call_operand.vmem [shape: f32[4,16], index: 7, kind: input, shape index: {}]   ;;  %s2437_s8 = inlined_call_operand.vmem [shape: f32[8,16], index: 8, kind: input, shape index: {}]   ;;  %s2438_s9 = inlined_call_operand.vmem [shape: f32[36,72], index: 9, kind: input, shape index: {}]   ;;  %s2439_s10 = inlined_call_operand.vmem [shape: f32[8,72], index: 10, kind: input, shape index: {}]   ;;  %s2440_s11 = inlined_call_operand.vmem [shape: f32[8,8], index: 11, kind: input, shape index: {}]   ;;  %s2441_s12 = inlined_call_operand.hbm [shape: f32[2,72,256], index: 12, kind: input, shape index: {}]   ;;  %s2442_s13 = inlined_call_operand.vmem [shape: f32[8,256], index: 13, kind: output, shape index: {0}]   ;;  %s2443_s14 = inlined_call_operand.vmem [shape: f32[8,256], index: 14, kind: output, shape index: {1}]  }
   0x1   :  { %s49_s15 = sshll.u32 %s2441_s12, 4  ;;  %s51_s17 = sshll.u32 %s1710_s16, 4  ;;  %s50_s15 = int_to_ptr.hbm [resolvable:$true] %s49_s15  ;;  %s52_s17 = int_to_ptr.vmem [resolvable:$true] %s51_s17 }
   0x2   :  { %s1712_s19 = smov 16  }
   0x3   :  { %57 = dma.hbm_to_vmem [thread:$0]  %s50_s15, 4608, %s52_s17, [#allocation3], %s1711_s18, %s1711_s18, %s1712_s19  }
   0x4   :  { %1708 = dma.done.wait [#allocation3], 4608  }
   0x5   :  { %1709 = vsyncadd [#allocation3], 4294962688  ;;  %v1808_v0 = vld [vmem:[%s2429_s0] sm:$0xff]  ;;  %v1813_v1 = vld [vmem:[%s2429_s0 + $0x8] sm:$0xff]  ;;  %vm84_vm0 = vcmask 64512   ;;  %vm131_vm1 = vcmask 1043456   ;;  %v214_v37 = vlaneseq }
   0x6   :  { %v74_v2 = vadd.f32 %v1813_v1, %v1808_v0  ;;  %v78_v4 = vld [vmem:[%s2430_s1] sm:$0xff]  ;;  %vm127_vm5 = vcmask 31744   ;;  %s1713_s30 = smov 94   ;;  %s1714_s15 = smov 96   ;;  %v157_v25 = vld [vmem:[%s2432_s3 + $0x8] sm:$0xff]  ;;  %v1876_v28 = vld [vmem:[%s2438_s9 + $0x18] sm:$0xff] }
   0x7   :  { %v1823_v7 = vld [vmem:[%s2435_s6] sm:$0xff]  ;;  %263 = vrot.lane.b32.xlu1 %v1813_v1, %s1713_s30  ;;  %256 = vrot.lane.b32.xlu2 %v1813_v1, %s1714_s15  ;;  %s1715_s16 = smov 2   ;;  %s1716_s17 = smov 98   ;;  %v1883_v29 = vld [vmem:[%s2438_s9 + $0x10] sm:$0xff]  ;;  %vm158_vm7 = vcmask 130048   ;;  %v1914_v38 = vand.u32 127, %v214_v37 }
   0x8   :  { %75 = vadd.xlane.f32.xlu0 %v74_v2  ;;  %v1830_v8 = vld [vmem:[%s2436_s7] sm:$0xf]  ;;  %s1717_s18 = smov 126   ;;  %s1718_s19 = smov 30   ;;  %176 = vmatpush.msra.mxu2 %v157_v25  ;;  %v1889_v30 = vld [vmem:[%s2438_s9 + $0x8] sm:$0xff]  ;;  %v1928_v46 = vld [vmem:[#allocation2 + $0x70] sm:$0xff] }
   0x9   :  { %1558 = vmatpush.msk.msra.mxu1 %vm131_vm1, %v1830_v8  ;;  %v1646_v9 = vld [vmem:[%s2431_s2] ss:$0 sm:$0xff]  ;;  %s1719_s22 = smov 32   ;;  %s1720_s23 = smov 34   ;;  %v1918_v41 = vld [vmem:[#allocation2 + $0x88] sm:$0xff]  ;;  %vm265_vm8 = vcmp.lt.s32.totalorder %v1914_v38, 94 }
   0xa   :  { %v156_v26 = vld [vmem:[%s2432_s3] sm:$0xff]  ;;  %vm258_vm9 = vcmp.lt.s32.totalorder %v1914_v38, 96  ;;  %v1930_v47 = vld [vmem:[#allocation2 + $0x78] sm:$0xff]  ;;  %vm251_vm10 = vcmp.lt.s32.totalorder %v1914_v38, 98  ;;  %v1941_v55 = vld [vmem:[#allocation2 + $0x68] sm:$0xff]  ;;  %vm244_vm11 = vcmp.lt.s32.totalorder %v1914_v38, 126 }
   0xb   :  { %177 = vmatpush.msra.mxu2 %v156_v26  ;;  %v1871_v27 = vld [vmem:[%s2438_s9 + $0x20] sm:$0xf]  ;;  %vm237_vm12 = vcmp.lt.s32.totalorder %v1914_v38, 2  ;;  %v1953_v2 = vld [vmem:[#allocation2 + $0x50] sm:$0xff]  ;;  %vm182_vm13 = vcmask 293888   ;;  %vm230_vm14 = vcmp.lt.s32.totalorder %v1914_v38, 30 }
   0xc   :  { %1561 = vmatpush.msk.msra.mxu3 %vm131_vm1, %v1871_v27  ;;  %v1896_v31 = vld [vmem:[%s2437_s8] sm:$0xff]  ;;  %vm223_vm15 = vcmp.lt.s32.totalorder %v1914_v38, 32  ;;  %v1992_v37 = vld [vmem:[#allocation2 + $0x10] sm:$0xff]  ;;  %s1722_s28 = smov 60   ;;  %s1723_s21 = smov 68  }
   0xd   :  { %v1911_v34 = vld [vmem:[%s2438_s9] sm:$0xff] }
   0xe   :  { %201 = vmatpush.msra.mxu3 %v1876_v28  ;;  %v1916_v40 = vld [vmem:[#allocation2 + $0x80] sm:$0xff] }
   0xf   :  { %254 = vrot.lane.b32.xlu1 %v1808_v0, %s1714_s15  ;;  %247 = vrot.lane.b32.xlu2 %v1808_v0, %s1716_s17  ;;  %v1939_v54 = vld [vmem:[#allocation2 + $0x60] sm:$0xff] }
  0x10   :  { %202 = vmatpush.msra.mxu3 %v1883_v29  ;;  %v1951_v63 = vld [vmem:[#allocation2 + $0x40] sm:$0xff] }
  0x12   :  { %203 = vmatpush.msra.mxu3 %v1889_v30 }
  0x14   :  { %204 = vmatpush.msra.mxu3 %v1911_v34 }
  0x17   :  { %249 = vrot.lane.b32.xlu1 %v1813_v1, %s1716_s17  ;;  %240 = vrot.lane.b32.xlu2 %v1808_v0, %s1717_s18 }
  0x1c   :  { %261 = vrot.lane.b32.xlu0 %v1808_v0, %s1713_s30 }
  0x1f   :  { %242 = vrot.lane.b32.xlu1 %v1813_v1, %s1717_s18  ;;  %233 = vrot.lane.b32.xlu2 %v1808_v0, %s1715_s16 }
  0x24   :  { %235 = vrot.lane.b32.xlu0 %v1813_v1, %s1715_s16 }
  0x27   :  { %226 = vrot.lane.b32.xlu1 %v1808_v0, %s1718_s19  ;;  %228 = vrot.lane.b32.xlu2 %v1813_v1, %s1718_s19 }
  0x2c   :  { %219 = vrot.lane.b32.xlu0 %v1808_v0, %s1719_s22 }
  0x2f   :  { %221 = vrot.lane.b32.xlu1 %v1813_v1, %s1719_s22  ;;  %210 = vrot.lane.b32.xlu2 %v1808_v0, %s1720_s23 }
  0x34   :  { %212 = vrot.lane.b32.xlu0 %v1813_v1, %s1720_s23 }
  0x61   :  { %v257_v36 = vpop.permute.xlu2 %256 }
  0x69   :  { %v248_v49 = vpop.permute.xlu2 %247 }
  0x71   :  { %v241_v57 = vpop.permute.xlu2 %240 }
  0x79   :  { %v264_v35 = vpop.permute.xlu1 %263 }
  0x7b   :  { %v76_v3 = vpop.xlane.xlu0 %75 }
  0x7c   :  { %v77_v5 = vmul.f32 0.00390625, %v76_v3  ;;  %v1955_v3 = vld [vmem:[#allocation2 + $0x58] sm:$0xff] }
  0x7e   :  { %v79_v6 = vmul.f32 %v78_v4, %v77_v5  ;;  %v1957_v4 = vld [vmem:[#allocation2 + $0x48] sm:$0xff] }
  0x80   :  { %103 = vmatpush.msra.mxu0 %v79_v6  ;;  %v234_v6 = vpop.permute.xlu2 %233 }
  0x81   :  { %1556 = vmatmul.msk.f32.vlgmr.msra.gmra.mxu0 %vm84_vm0, %v1823_v7  ;;  %v255_v48 = vpop.permute.xlu1 %254 }
  0x82   :  { %v259_v50 = vsel %vm258_vm9, %v255_v48, %v257_v36  ;;  %v260_v51 = vsel %vm258_vm9, %v257_v36, %v255_v48 }
  0x83   :  { %v300_v52 = vmul.f32 %v1928_v46, %v259_v50  ;;  %v301_v53 = vmul.f32 %v1930_v47, %v260_v51 }
  0x88   :  { %v229_v25 = vpop.permute.xlu2 %228 }
  0x89   :  { %v250_v56 = vpop.permute.xlu1 %249 }
  0x8a   :  { %v252_v58 = vsel %vm251_vm10, %v248_v49, %v250_v56  ;;  %v253_v59 = vsel %vm251_vm10, %v250_v56, %v248_v49  ;;  %v2009_v56 = vld [vmem:[#allocation2 + $0x8] sm:$0xff] }
  0x8b   :  { %v298_v60 = vmul.f32 %v1939_v54, %v252_v58  ;;  %v299_v61 = vmul.f32 %v1941_v55, %v253_v59  ;;  %v2018_v59 = vld [vmem:[%s2439_s10] sm:$0xff] }
  0x8e   :  { %v262_v39 = vpop.permute.xlu0 %261 }
  0x8f   :  { %v266_v42 = vsel %vm265_vm8, %v262_v39, %v264_v35  ;;  %v267_v43 = vsel %vm265_vm8, %v264_v35, %v262_v39  ;;  %v1994_v39 = vld [vmem:[#allocation2 + $0x18] sm:$0xff] }
  0x90   :  { %v302_v44 = vmul.f32 %v1916_v40, %v266_v42  ;;  %v303_v45 = vmul.f32 %v1918_v41, %v267_v43  ;;  %v211_v49 = vpop.permute.xlu2 %210 }
  0x91   :  { %v243_v5 = vpop.permute.xlu1 %242 }
  0x92   :  { %315 = vmatpush.msrb.mxu0 %v302_v44  ;;  %335 = vmatpush.msrb.mxu1 %v303_v45 }
  0x94   :  { %316 = vmatpush.msrb.mxu0 %v300_v52  ;;  %336 = vmatpush.msrb.mxu1 %v301_v53  ;;  %v2007_v53 = vld [vmem:[#allocation2] sm:$0xff] }
  0x96   :  { %317 = vmatpush.msrb.mxu0 %v298_v60  ;;  %337 = vmatpush.msrb.mxu1 %v299_v61  ;;  %v236_v62 = vpop.permute.xlu0 %235 }
  0x9e   :  { %v220_v36 = vpop.permute.xlu0 %219 }
  0xa6   :  { %v213_v50 = vpop.permute.xlu0 %212 }
  0xfe   :  { %v105_v10 = vpop.f32.mrf.mxu0 }
  0xff   :  { %v106_v11 = vadd.f32 %v1646_v9, %v105_v10  ;;  %v245_v9 = vsel %vm244_vm11, %v241_v57, %v243_v5  ;;  %v246_v10 = vsel %vm244_vm11, %v243_v5, %v241_v57 }
 0x101   :  { %v1557_v12 = vmul.f32 -1.442695, %v106_v11  ;;  %v239_v11 = vsel %vm237_vm12, %v236_v62, %v234_v6 }
 0x103   :  { %1650 = vpow2.f32 %v1557_v12  ;;  %v294_v12 = vmul.f32 %v1951_v63, %v1808_v0 }
 0x109   :  { %v1651_v13 = vpop.eup %1650 }
 0x10a   :  { %v111_v14 = vadd.f32 1.0, %v1651_v13  ;;  %v1967_v13 = vld [vmem:[#allocation2 + $0x30] sm:$0xff] }
 0x10c   :  { %1652 = vrcp.f32 %v111_v14  ;;  %v123_v18 = vand.u32 2147483648, %v111_v14  ;;  %v121_v20 = vand.u32 2147483647, %v111_v14  ;;  %vm117_vm3 = vweird.f32 %v111_v14 }
 0x10e   :  { %v124_v22 = vor.u32 1.1754944e-38, %v123_v18  ;;  %vm122_vm6 = vcmp.eq.f32.partialorder %v121_v20, 8.507059e+37  ;;  %v1975_v18 = vld [vmem:[#allocation2 + $0x38] sm:$0xff] }
 0x112   :  { %v1653_v15 = vpop.eup %1652 }
 0x113   :  { %v113_v16 = vmul.f32 %v1653_v15, %v111_v14  ;;  %vm118_vm2 = vweird.f32 %v1653_v15  ;;  %v296_v14 = vmul.f32 %v1953_v2, %v245_v9 }
 0x114   :  { %vm119_vm4 = vmor %vm117_vm3, %vm118_vm2  ;;  %vm216_vm2 = vcmp.lt.s32.totalorder %v1914_v38, 34  ;;  %vm2444_vm3 = vcmask 588800  }
 0x115   :  { %v114_v17 = vsub.f32 1.0, %v113_v16  ;;  %v238_v16 = vsel %vm237_vm12, %v234_v6, %v236_v62  ;;  %318 = vmatpush.msrb.mxu0 %v296_v14  ;;  %v217_v51 = vsel %vm216_vm2, %v211_v49, %v213_v50  ;;  %v218_v52 = vsel %vm216_vm2, %v213_v50, %v211_v49  ;;  %v2026_v62 = vld [vmem:[%s2440_s11] sm:$0xff] }
 0x116   :  { %v293_v20 = vmul.f32 %v1975_v18, %v238_v16  ;;  %v286_v57 = vmul.f32 %v2007_v53, %v218_v52  ;;  %v287_v58 = vmul.f32 %v2009_v56, %v217_v51 }
 0x117   :  { %v115_v19 = vmul.f32 %v1653_v15, %v114_v17  ;;  %v295_v17 = vmul.f32 %v1957_v4, %v1813_v1  ;;  %319 = vmatpush.msrb.mxu0 %v294_v12 }
 0x119   :  { %v116_v21 = vadd.f32 %v1653_v15, %v115_v19  ;;  %v292_v19 = vmul.f32 %v1967_v13, %v239_v11 }
 0x11b   :  { %v120_v23 = vsel %vm119_vm4, %v1653_v15, %v116_v21  ;;  %v297_v15 = vmul.f32 %v1955_v3, %v246_v10  ;;  %320 = vmatpush.msrb.mxu0 %v292_v19 }
 0x11c   :  { %v125_v24 = vsel %vm122_vm6, %v124_v22, %v120_v23  ;;  %v1980_v22 = vld [vmem:[#allocation2 + $0x20] sm:$0xff]  ;;  %v1982_v23 = vld [vmem:[#allocation2 + $0x28] sm:$0xff] }
 0x11d   :  { %1559 = vmatmul.msk.f32.vlgmr.msra.gmra.mxu1 %vm127_vm5, %v125_v24  ;;  %v227_v24 = vpop.permute.xlu1 %226 }
 0x11e   :  { %338 = vmatpush.msrb.mxu1 %v297_v15  ;;  %v231_v26 = vsel %vm230_vm14, %v227_v24, %v229_v25 }
 0x11f   :  { %v291_v35 = vmul.f32 %v1982_v23, %v231_v26 }
 0x120   :  { %339 = vmatpush.msrb.mxu1 %v295_v17 }
 0x122   :  { %340 = vmatpush.msrb.mxu1 %v293_v20  ;;  %v456_v20 = vld [vmem:[%s2433_s4] sm:$0xff] }
 0x124   :  { %341 = vmatpush.msrb.mxu1 %v291_v35 }
 0x125   :  { %v222_v42 = vpop.permute.xlu1 %221 }
 0x126   :  { %v224_v43 = vsel %vm223_vm15, %v220_v36, %v222_v42  ;;  %v225_v44 = vsel %vm223_vm15, %v222_v42, %v220_v36 }
 0x127   :  { %v288_v45 = vmul.f32 %v1992_v37, %v225_v44  ;;  %v289_v48 = vmul.f32 %v1994_v39, %v224_v43 }
 0x129   :  { %342 = vmatpush.msrb.mxu1 %v289_v48 }
 0x12b   :  { %343 = vmatpush.msrb.mxu1 %v287_v58 }
 0x12d   :  { %1573 = vmatpush.msk.msra.mxu1 %vm131_vm1, %v1830_v8 }
 0x19a   :  { %v152_v32 = vpop.f32.mrf.mxu1 }
 0x19b   :  { %v155_v33 = vmul.f32 %v152_v32, %v1896_v31  ;;  %v232_v32 = vsel %vm230_vm14, %v229_v25, %v227_v24  ;;  %v464_v24 = vld [vmem:[%s2434_s5] sm:$0xff] }
 0x19d   :  { %1560 = vmatmul.msk.f32.vlgmr.msra.gmra.mxu2 %vm158_vm7, %v155_v33  ;;  %v290_v33 = vmul.f32 %v1980_v22, %v232_v32 }
 0x19f   :  { %321 = vmatpush.msrb.mxu0 %v290_v33 }
 0x1a1   :  { %322 = vmatpush.msrb.mxu0 %v288_v45 }
 0x1a3   :  { %323 = vmatpush.msrb.mxu0 %v286_v57 }
 0x220   :  { %v179_v21 = vpop.f32.mrf.mxu2 }
 0x221   :  { %1562 = vmatmul.msk.f32.vlgmr.msra.gmra.mxu3 %vm182_vm13, %v179_v21  ;;  %v1721_v21 = vmov 0  }
 0x222   :  { %1643 = vset.pattern.permute.xlu0 %v1721_v21  ;;  %1644 = vset.pattern.permute.xlu2 %v1721_v21 }
 0x223   :  { %459 = vperm.xlu0 %1643, %v456_v20   ;;  %1645 = vset.pattern.permute.xlu1 %v1721_v21  ;;  %v1569_v20 = vld [vmem:[%s2430_s1 + $0x8] sm:$0xff] }
 0x22b   :  { %467 = vperm.xlu0 %1643, %v464_v24  }
 0x295   :  { %v460_v48 = vpop.permute.xlu0 %459 }
 0x2a4   :  { %v206_v60 = vpop.f32.mrf.mxu3 }
 0x2a5   :  { %v209_v61 = vmul.f32 %v206_v60, %v2018_v59 }
 0x2a7   :  { %1563 = vmatmul.msk.f32.vlgmr.msrb.gmra.mxu0 %vm2444_vm3, %v209_v61  ;;  %1564 = vmatmul.msk.f32.vlgmr.msrb.gmra.mxu1 %vm2444_vm3, %v209_v61  ;;  %v468_v61 = vpop.permute.xlu0 %467 }
 0x324   :  { %v325_v5 = vpop.f32.mrf.mxu0  ;;  %v345_v6 = vpop.f32.mrf.mxu1 }
 0x325   :  { %366 = vmatpush.msrb.mxu2 %v325_v5  ;;  %386 = vmatpush.msrb.mxu3 %v345_v6 }
 0x326   :  { %1565 = vmatmul.msk.f32.vlgmr.msrb.gmra.mxu2 %vm84_vm0, %v2026_v62  ;;  %1566 = vmatmul.msk.f32.vlgmr.msrb.gmra.mxu3 %vm84_vm0, %v2026_v62 }
 0x3a9   :  { %v368_v9 = vpop.f32.mrf.mxu2  ;;  %v388_v10 = vpop.f32.mrf.mxu3 }
 0x3aa   :  { %v391_v11 = vadd.f32 %v388_v10, %v368_v9 }
 0x3ac   :  { %392 = vadd.xlane.f32.xlu1 %v391_v11 }
 0x41f   :  { %v393_v12 = vpop.xlane.xlu1 %392 }
 0x420   :  { %v394_v14 = vmul.f32 0.001953125, %v393_v12 }
 0x422   :  { %v395_v15 = vsub.f32 %v325_v5, %v394_v14  ;;  %v396_v16 = vsub.f32 %v345_v6, %v394_v14 }
 0x424   :  { %v397_v17 = vmul.f32 %v395_v15, %v395_v15  ;;  %v398_v19 = vmul.f32 %v396_v16, %v396_v16 }
 0x426   :  { %414 = vmatpush.msra.mxu2 %v397_v17  ;;  %434 = vmatpush.msra.mxu3 %v398_v19 }
 0x427   :  { %1567 = vmatmul.msk.f32.vlgmr.msra.gmra.mxu2 %vm84_vm0, %v2026_v62  ;;  %1568 = vmatmul.msk.f32.vlgmr.msra.gmra.mxu3 %vm84_vm0, %v2026_v62 }
 0x428   :  { %1578 = vmatpush.msk.msrb.mxu3 %vm131_vm1, %v1871_v27 }
 0x42a   :  { %590 = vmatpush.msrb.mxu3 %v1876_v28 }
 0x42c   :  { %591 = vmatpush.msrb.mxu3 %v1883_v29 }
 0x42e   :  { %592 = vmatpush.msrb.mxu3 %v1889_v30 }
 0x430   :  { %593 = vmatpush.msrb.mxu3 %v1911_v34 }
 0x4aa   :  { %v416_v25 = vpop.f32.mrf.mxu2  ;;  %v436_v26 = vpop.f32.mrf.mxu3 }
 0x4ab   :  { %v439_v32 = vadd.f32 %v436_v26, %v416_v25 }
 0x4ad   :  { %440 = vadd.xlane.f32.xlu2 %v439_v32 }
 0x520   :  { %v441_v33 = vpop.xlane.xlu2 %440 }
 0x521   :  { %v442_v35 = vmul.f32 0.001953125, %v441_v33 }
 0x523   :  { %v443_v36 = vadd.f32 1e-05, %v442_v35 }
 0x525   :  { %1654 = vrsqrt.f32 %v443_v36  ;;  %vm450_vm6 = vweird.f32 %v443_v36 }
 0x52b   :  { %v1655_v42 = vpop.eup %1654 }
 0x52c   :  { %v445_v43 = vmul.f32 %v1655_v42, %v443_v36  ;;  %vm451_vm4 = vweird.f32 %v1655_v42 }
 0x52d   :  { %vm452_vm3 = vmor %vm450_vm6, %vm451_vm4  ;;  %vm980_vm4 = vcmp.lt.s32.totalorder %v1914_v38, 60  ;;  %vm973_vm6 = vcmp.lt.s32.totalorder %v1914_v38, 64 }
 0x52e   :  { %v446_v44 = vmul.f32 %v1655_v42, %v445_v43 }
 0x530   :  { %v447_v45 = vmul.f32 0.5, %v446_v44 }
 0x532   :  { %v448_v49 = vsub.f32 1.5, %v447_v45 }
 0x534   :  { %v449_v50 = vmul.f32 %v1655_v42, %v448_v49 }
 0x536   :  { %v453_v51 = vsel %vm452_vm3, %v1655_v42, %v449_v50 }
 0x537   :  { %v454_v52 = vmul.f32 %v453_v51, %v395_v15  ;;  %v455_v57 = vmul.f32 %v453_v51, %v396_v16 }
 0x539   :  { %v462_v58 = vmul.f32 %v460_v48, %v454_v52  ;;  %v463_v60 = vmul.f32 %v460_v48, %v455_v57 }
 0x53b   :  { %v470_v5 = vadd.f32 %v468_v61, %v462_v58  ;;  %v471_v6 = vadd.f32 %v468_v61, %v463_v60 }
 0x53d   :  { %v472_v9 = vmax.f32 %v470_v5, 0.0  ;;  %v473_v10 = vmax.f32 %v471_v6, 0.0 }
 0x53f   :  { %643 = vrot.lane.b32.xlu1 %v473_v10, %s1713_s30  ;;  %641 = vrot.lane.b32.xlu2 %v472_v9, %s1713_s30  ;;  %v474_v11 = vadd.f32 %v473_v10, %v472_v9  ;;  %v655_v5 = vmul.f32 %v472_v9, %v1951_v63  ;;  %s1724_s30 = smov 64  }
 0x541   :  { %475 = vadd.xlane.f32.xlu0 %v474_v11 }
 0x547   :  { %637 = vrot.lane.b32.xlu1 %v473_v10, %s1714_s15  ;;  %635 = vrot.lane.b32.xlu2 %v472_v9, %s1714_s15  ;;  %s1725_s15 = smov 124  }
 0x54f   :  { %623 = vrot.lane.b32.xlu1 %v472_v9, %s1717_s18  ;;  %631 = vrot.lane.b32.xlu2 %v473_v10, %s1716_s17 }
 0x555   :  { %629 = vrot.lane.b32.xlu0 %v472_v9, %s1716_s17 }
 0x557   :  { %617 = vrot.lane.b32.xlu1 %v472_v9, %s1715_s16  ;;  %625 = vrot.lane.b32.xlu2 %v473_v10, %s1717_s18 }
 0x55d   :  { %611 = vrot.lane.b32.xlu0 %v472_v9, %s1718_s19 }
 0x55f   :  { %613 = vrot.lane.b32.xlu1 %v473_v10, %s1718_s19  ;;  %619 = vrot.lane.b32.xlu2 %v473_v10, %s1715_s16  ;;  %s1726_s16 = smov 4  }
 0x565   :  { %607 = vrot.lane.b32.xlu0 %v473_v10, %s1719_s22 }
 0x567   :  { %599 = vrot.lane.b32.xlu1 %v472_v9, %s1720_s23  ;;  %605 = vrot.lane.b32.xlu2 %v472_v9, %s1719_s22 }
 0x56f   :  { %601 = vrot.lane.b32.xlu2 %v473_v10, %s1720_s23 }
 0x599   :  { %v642_v12 = vpop.permute.xlu2 %641 }
 0x5a1   :  { %v636_v14 = vpop.permute.xlu2 %635 }
 0x5a9   :  { %v632_v15 = vpop.permute.xlu2 %631 }
 0x5b1   :  { %v644_v16 = vpop.permute.xlu1 %643  ;;  %v626_v36 = vpop.permute.xlu2 %625 }
 0x5b2   :  { %v646_v17 = vsel %vm265_vm8, %v644_v16, %v642_v12  ;;  %v645_v25 = vsel %vm265_vm8, %v642_v12, %v644_v16 }
 0x5b3   :  { %v664_v19 = vmul.f32 %v646_v17, %v1918_v41  ;;  %v663_v32 = vmul.f32 %v645_v25, %v1916_v40 }
 0x5b4   :  { %v476_v21 = vpop.xlane.xlu0 %475 }
 0x5b5   :  { %v477_v24 = vmul.f32 0.00390625, %v476_v21  ;;  %695 = vmatpush.msrb.mxu1 %v664_v19 }
 0x5b7   :  { %v480_v26 = vmul.f32 %v1569_v20, %v477_v24 }
 0x5b9   :  { %v638_v33 = vpop.permute.xlu1 %637  ;;  %501 = vmatpush.msra.mxu0 %v480_v26  ;;  %v620_v44 = vpop.permute.xlu2 %619 }
 0x5ba   :  { %v639_v35 = vsel %vm258_vm9, %v636_v14, %v638_v33  ;;  %v640_v41 = vsel %vm258_vm9, %v638_v33, %v636_v14  ;;  %1571 = vmatmul.msk.f32.vlgmr.msra.gmra.mxu0 %vm84_vm0, %v1823_v7 }
 0x5bb   :  { %v661_v42 = vmul.f32 %v639_v35, %v1928_v46  ;;  %v662_v43 = vmul.f32 %v640_v41, %v1930_v47  ;;  %675 = vmatpush.msrb.mxu0 %v663_v32 }
 0x5bd   :  { %676 = vmatpush.msrb.mxu0 %v661_v42  ;;  %696 = vmatpush.msrb.mxu1 %v662_v43 }
 0x5c1   :  { %v624_v40 = vpop.permute.xlu1 %623 }
 0x5c2   :  { %v627_v48 = vsel %vm244_vm11, %v624_v40, %v626_v36  ;;  %v628_v49 = vsel %vm244_vm11, %v626_v36, %v624_v40  ;;  %v1576_v40 = vld [vmem:[%s2432_s3 + $0x18] sm:$0xff] }
 0x5c3   :  { %v657_v57 = vmul.f32 %v627_v48, %v1953_v2  ;;  %v658_v58 = vmul.f32 %v628_v49, %v1955_v3  ;;  %569 = vmatpush.msrb.mxu2 %v1576_v40 }
 0x5c7   :  { %v630_v45 = vpop.permute.xlu0 %629 }
 0x5c8   :  { %v633_v50 = vsel %vm251_vm10, %v630_v45, %v632_v15  ;;  %v634_v46 = vsel %vm251_vm10, %v632_v15, %v630_v45 }
 0x5c9   :  { %v659_v47 = vmul.f32 %v633_v50, %v1939_v54  ;;  %v660_v51 = vmul.f32 %v634_v46, %v1941_v55  ;;  %v618_v52 = vpop.permute.xlu1 %617  ;;  %v656_v54 = vmul.f32 %v473_v10, %v1957_v4  ;;  %v606_v55 = vpop.permute.xlu2 %605 }
 0x5ca   :  { %v621_v60 = vsel %vm237_vm12, %v618_v52, %v620_v44  ;;  %v622_v61 = vsel %vm237_vm12, %v620_v44, %v618_v52  ;;  %v1575_v44 = vld [vmem:[%s2432_s3 + $0x10] sm:$0xff]  ;;  %vm2445_vm12 = vcmask 588800  }
 0x5cb   :  { %677 = vmatpush.msrb.mxu0 %v659_v47  ;;  %697 = vmatpush.msrb.mxu1 %v660_v51  ;;  %v653_v6 = vmul.f32 %v622_v61, %v1967_v13  ;;  %v654_v2 = vmul.f32 %v621_v60, %v1975_v18 }
 0x5cc   :  { %570 = vmatpush.msrb.mxu2 %v1575_v44 }
 0x5cd   :  { %678 = vmatpush.msrb.mxu0 %v657_v57  ;;  %698 = vmatpush.msrb.mxu1 %v658_v58 }
 0x5cf   :  { %679 = vmatpush.msrb.mxu0 %v655_v5  ;;  %699 = vmatpush.msrb.mxu1 %v656_v54  ;;  %v612_v3 = vpop.permute.xlu0 %611 }
 0x5d1   :  { %v614_v11 = vpop.permute.xlu1 %613  ;;  %680 = vmatpush.msrb.mxu0 %v653_v6  ;;  %700 = vmatpush.msrb.mxu1 %v654_v2  ;;  %v602_v10 = vpop.permute.xlu2 %601 }
 0x5d2   :  { %v615_v12 = vsel %vm230_vm14, %v612_v3, %v614_v11  ;;  %v616_v14 = vsel %vm230_vm14, %v614_v11, %v612_v3  ;;  %vm2446_vm14 = vmmov %vm2445_vm12  ;;  %v1587_v3 = vld [vmem:[%s2434_s5 + $0x8] sm:$0xff] }
 0x5d3   :  { %v651_v63 = vmul.f32 %v616_v14, %v1980_v22  ;;  %v652_v4 = vmul.f32 %v615_v12, %v1982_v23 }
 0x5d5   :  { %681 = vmatpush.msrb.mxu0 %v651_v63  ;;  %701 = vmatpush.msrb.mxu1 %v652_v4 }
 0x5d7   :  { %v608_v13 = vpop.permute.xlu0 %607 }
 0x5d8   :  { %v609_v18 = vsel %vm223_vm15, %v606_v55, %v608_v13  ;;  %v610_v9 = vsel %vm223_vm15, %v608_v13, %v606_v55 }
 0x5d9   :  { %v649_v15 = vmul.f32 %v610_v9, %v1992_v37  ;;  %v650_v16 = vmul.f32 %v609_v18, %v1994_v39  ;;  %v600_v17 = vpop.permute.xlu1 %599  ;;  %v1647_v37 = vld [vmem:[%s2431_s2 + $0x1] ss:$0 sm:$0xff] }
 0x5da   :  { %v603_v22 = vsel %vm216_vm2, %v600_v17, %v602_v10  ;;  %v604_v23 = vsel %vm216_vm2, %v602_v10, %v600_v17 }
 0x5db   :  { %v647_v19 = vmul.f32 %v604_v23, %v2007_v53  ;;  %v648_v20 = vmul.f32 %v603_v22, %v2009_v56  ;;  %682 = vmatpush.msrb.mxu0 %v649_v15  ;;  %702 = vmatpush.msrb.mxu1 %v650_v16 }
 0x5dd   :  { %683 = vmatpush.msrb.mxu0 %v647_v19  ;;  %703 = vmatpush.msrb.mxu1 %v648_v20 }
 0x5df   :  { %1592 = vmatpush.msk.msra.mxu0 %vm131_vm1, %v1830_v8 }
 0x637   :  { %v503_v39 = vpop.f32.mrf.mxu0 }
 0x638   :  { %v504_v21 = vadd.f32 %v1647_v37, %v503_v39 }
 0x63a   :  { %v1572_v24 = vmul.f32 -1.442695, %v504_v21 }
 0x63c   :  { %1656 = vpow2.f32 %v1572_v24  ;;  %v1605_v24 = vld [vmem:[%s2433_s4 + $0x10] sm:$0xff] }
 0x642   :  { %v1657_v25 = vpop.eup %1656 }
 0x643   :  { %v509_v26 = vadd.f32 1.0, %v1657_v25  ;;  %v1606_v25 = vld [vmem:[%s2434_s5 + $0x10] sm:$0xff] }
 0x645   :  { %1658 = vrcp.f32 %v509_v26  ;;  %v521_v33 = vand.u32 2147483648, %v509_v26  ;;  %v519_v41 = vand.u32 2147483647, %v509_v26  ;;  %vm515_vm9 = vweird.f32 %v509_v26 }
 0x647   :  { %v522_v8 = vor.u32 1.1754944e-38, %v521_v33  ;;  %vm520_vm11 = vcmp.eq.f32.partialorder %v519_v41, 8.507059e+37 }
 0x64b   :  { %v1659_v53 = vpop.eup %1658 }
 0x64c   :  { %v511_v56 = vmul.f32 %v1659_v53, %v509_v26  ;;  %vm516_vm8 = vweird.f32 %v1659_v53  ;;  %v2200_v26 = vld [vmem:[#allocation2 + $0x118] sm:$0xff] }
 0x64d   :  { %vm517_vm10 = vmor %vm515_vm9, %vm516_vm8  ;;  %vm966_vm8 = vcmp.lt.s32.totalorder %v1914_v38, 68  ;;  %vm994_vm9 = vcmp.lt.s32.totalorder %v1914_v38, 124 }
 0x64e   :  { %v512_v32 = vsub.f32 1.0, %v511_v56 }
 0x650   :  { %v513_v35 = vmul.f32 %v1659_v53, %v512_v32 }
 0x652   :  { %v514_v36 = vadd.f32 %v1659_v53, %v513_v35  ;;  %v1588_v35 = vld [vmem:[%s2430_s1 + $0x10] sm:$0xff] }
 0x654   :  { %v518_v42 = vsel %vm517_vm10, %v1659_v53, %v514_v36  ;;  %vm987_vm10 = vcmp.lt.s32.totalorder %v1914_v38, 4 }
 0x655   :  { %v523_v43 = vsel %vm520_vm11, %v522_v8, %v518_v42  ;;  %v2211_v8 = vld [vmem:[#allocation2 + $0x110] sm:$0xff] }
 0x656   :  { %1574 = vmatmul.msk.f32.vlgmr.msra.gmra.mxu1 %vm127_vm5, %v523_v43 }
 0x6d3   :  { %v545_v45 = vpop.f32.mrf.mxu1 }
 0x6d4   :  { %v548_v48 = vmul.f32 %v545_v45, %v1896_v31  ;;  %v2219_v45 = vld [vmem:[#allocation2 + $0x100] sm:$0xff] }
 0x6d6   :  { %1577 = vmatmul.msk.f32.vlgmr.msrb.gmra.mxu2 %vm158_vm7, %v548_v48  ;;  %v2221_v48 = vld [vmem:[#allocation2 + $0x108] sm:$0xff] }
 0x759   :  { %v572_v49 = vpop.f32.mrf.mxu2 }
 0x75a   :  { %1579 = vmatmul.msk.f32.vlgmr.msrb.gmra.mxu3 %vm182_vm13, %v572_v49 }
 0x7dd   :  { %v595_v50 = vpop.f32.mrf.mxu3 }
 0x7de   :  { %v598_v46 = vmul.f32 %v595_v50, %v2018_v59 }
 0x7e0   :  { %1580 = vmatmul.msk.f32.vlgmr.msrb.gmra.mxu0 %vm2445_vm12, %v598_v46  ;;  %1581 = vmatmul.msk.f32.vlgmr.msrb.gmra.mxu1 %vm2446_vm14, %v598_v46 }
 0x85d   :  { %v685_v47 = vpop.f32.mrf.mxu0  ;;  %v705_v51 = vpop.f32.mrf.mxu1 }
 0x85e   :  { %v708_v52 = vadd.f32 %v685_v47, %v1808_v0  ;;  %v709_v57 = vadd.f32 %v705_v51, %v1813_v1  ;;  %v1586_v1 = vld [vmem:[%s2433_s4 + $0x8] sm:$0xff] }
 0x85f   :  { %819 = vperm.xlu2 %1644, %v1586_v1  }
 0x860   :  { %725 = vmatpush.msra.mxu2 %v708_v52 }
 0x861   :  { %1582 = vmatmul.msk.f32.vlgmr.msra.gmra.mxu2 %vm84_vm0, %v2026_v62 }
 0x862   :  { %745 = vmatpush.msrb.mxu2 %v709_v57 }
 0x867   :  { %828 = vperm.xlu2 %1644, %v1587_v3  }
 0x869   :  { %1583 = vmatmul.msk.f32.vlgmr.msrb.gmra.mxu2 %vm84_vm0, %v2026_v62 }
 0x8b9   :  { %v820_v13 = vpop.permute.xlu2 %819 }
 0x8c1   :  { %v829_v23 = vpop.permute.xlu2 %828 }
 0x8e4   :  { %v727_v58 = vpop.f32.mrf.mxu2 }
 0x8ec   :  { %v747_v60 = vpop.f32.mrf.mxu2 }
 0x8ed   :  { %v750_v61 = vadd.f32 %v747_v60, %v727_v58 }
 0x8ef   :  { %751 = vadd.xlane.f32.xlu0 %v750_v61 }
 0x962   :  { %v752_v5 = vpop.xlane.xlu0 %751 }
 0x963   :  { %v753_v54 = vmul.f32 0.001953125, %v752_v5 }
 0x965   :  { %v754_v55 = vsub.f32 %v708_v52, %v753_v54  ;;  %v755_v6 = vsub.f32 %v709_v57, %v753_v54  ;;  %v2232_v57 = vld [vmem:[#allocation2 + $0xf8] sm:$0xff] }
 0x967   :  { %v756_v2 = vmul.f32 %v754_v55, %v754_v55  ;;  %v757_v0 = vmul.f32 %v755_v6, %v755_v6 }
 0x969   :  { %773 = vmatpush.msra.mxu3 %v756_v2  ;;  %793 = vmatpush.msra.mxu2 %v757_v0  ;;  %v2243_v2 = vld [vmem:[#allocation2 + $0xe8] sm:$0xff] }
 0x96a   :  { %1584 = vmatmul.msk.f32.vlgmr.msra.gmra.mxu3 %vm84_vm0, %v2026_v62  ;;  %1585 = vmatmul.msk.f32.vlgmr.msra.gmra.mxu2 %vm84_vm0, %v2026_v62 }
 0x96b   :  { %1597 = vmatpush.msk.msrb.mxu2 %vm131_vm1, %v1871_v27 }
 0x96d   :  { %953 = vmatpush.msrb.mxu2 %v1876_v28 }
 0x96f   :  { %954 = vmatpush.msrb.mxu2 %v1883_v29 }
 0x971   :  { %955 = vmatpush.msrb.mxu2 %v1889_v30 }
 0x973   :  { %956 = vmatpush.msrb.mxu2 %v1911_v34 }
 0x9ed   :  { %v775_v11 = vpop.f32.mrf.mxu3  ;;  %v795_v27 = vpop.f32.mrf.mxu2 }
 0x9ee   :  { %v798_v12 = vadd.f32 %v795_v27, %v775_v11  ;;  %v2249_v11 = vld [vmem:[#allocation2 + $0xd0] sm:$0xff]  ;;  %v2251_v27 = vld [vmem:[#allocation2 + $0xd8] sm:$0xff] }
 0x9f0   :  { %799 = vadd.xlane.f32.xlu1 %v798_v12 }
 0xa63   :  { %v800_v28 = vpop.xlane.xlu1 %799 }
 0xa64   :  { %v801_v29 = vmul.f32 0.001953125, %v800_v28 }
 0xa66   :  { %v802_v14 = vadd.f32 1e-05, %v801_v29 }
 0xa68   :  { %1660 = vrsqrt.f32 %v802_v14  ;;  %vm809_vm2 = vweird.f32 %v802_v14 }
 0xa6e   :  { %v1661_v30 = vpop.eup %1660 }
 0xa6f   :  { %v804_v34 = vmul.f32 %v1661_v30, %v802_v14  ;;  %vm810_vm15 = vweird.f32 %v1661_v30 }
 0xa70   :  { %vm811_vm3 = vmor %vm809_vm2, %vm810_vm15  ;;  %vm2447_vm2 = vcmask 588800  }
 0xa71   :  { %v805_v63 = vmul.f32 %v1661_v30, %v804_v34  ;;  %v2262_v34 = vld [vmem:[#allocation2 + $0xc8] sm:$0xff] }
 0xa73   :  { %v806_v4 = vmul.f32 0.5, %v805_v63 }
 0xa75   :  { %v807_v18 = vsub.f32 1.5, %v806_v4 }
 0xa77   :  { %v808_v9 = vmul.f32 %v1661_v30, %v807_v18  ;;  %v2266_v18 = vld [vmem:[#allocation2 + $0xb8] sm:$0xff] }
 0xa79   :  { %v812_v10 = vsel %vm811_vm3, %v1661_v30, %v808_v9  ;;  %v2260_v30 = vld [vmem:[#allocation2 + $0xc0] sm:$0xff]  ;;  %vm2448_vm3 = vmmov %vm2447_vm2 }
 0xa7a   :  { %v813_v15 = vmul.f32 %v812_v10, %v754_v55  ;;  %v814_v16 = vmul.f32 %v812_v10, %v755_v6  ;;  %v2241_v6 = vld [vmem:[#allocation2 + $0xe0] sm:$0xff] }
 0xa7c   :  { %v822_v17 = vmul.f32 %v820_v13, %v813_v15  ;;  %v823_v22 = vmul.f32 %v820_v13, %v814_v16  ;;  %v2264_v13 = vld [vmem:[#allocation2 + $0xb0] sm:$0xff] }
 0xa7e   :  { %v831_v19 = vadd.f32 %v829_v23, %v822_v17  ;;  %v832_v20 = vadd.f32 %v829_v23, %v823_v22  ;;  %v2274_v17 = vld [vmem:[#allocation2 + $0xa0] sm:$0xff]  ;;  %v2276_v22 = vld [vmem:[#allocation2 + $0xa8] sm:$0xff] }
 0xa80   :  { %v2159_v37 = vmax.f32 %v831_v19, 0.0  ;;  %v2161_v39 = vmax.f32 %v832_v20, 0.0  ;;  %v2281_v20 = vld [vmem:[#allocation2 + $0x90] sm:$0xff] }
 0xa82   :  { %835 = vst [vmem:[%s2442_s13] sm:$0xff] %v2159_v37  ;;  %978 = vrot.lane.b32.xlu1 %v2161_v39, %s1722_s28  ;;  %976 = vrot.lane.b32.xlu0 %v2159_v37, %s1722_s28  ;;  %v837_v21 = vadd.f32 %v2161_v39, %v2159_v37  ;;  %v1024_v29 = vmul.f32 %v2249_v11, %v2159_v37 }
 0xa83   :  { %836 = vst [vmem:[%s2442_s13 + $0x8] sm:$0xff] %v2161_v39  ;;  %v1025_v14 = vmul.f32 %v2251_v27, %v2161_v39 }
 0xa84   :  { %838 = vadd.xlane.f32.xlu2 %v837_v21  ;;  %v2283_v21 = vld [vmem:[#allocation2 + $0x98] sm:$0xff] }
 0xa8a   :  { %962 = vrot.lane.b32.xlu1 %v2159_v37, %s1723_s21  ;;  %969 = vrot.lane.b32.xlu0 %v2159_v37, %s1724_s30 }
 0xa92   :  { %990 = vrot.lane.b32.xlu1 %v2159_v37, %s1725_s15  ;;  %964 = vrot.lane.b32.xlu0 %v2161_v39, %s1723_s21 }
 0xa9a   :  { %983 = vrot.lane.b32.xlu1 %v2159_v37, %s1726_s16  ;;  %992 = vrot.lane.b32.xlu0 %v2161_v39, %s1725_s15 }
 0xa9c   :  { %971 = vrot.lane.b32.xlu2 %v2161_v39, %s1724_s30 }
 0xaa2   :  { %985 = vrot.lane.b32.xlu0 %v2161_v39, %s1726_s16 }
 0xaaa   :  { %1186 = vperm.xlu0 %1643, %v1605_v24  }
 0xab2   :  { %1195 = vperm.xlu0 %1643, %v1606_v25  }
 0xaf4   :  { %v979_v53 = vpop.permute.xlu1 %978  ;;  %v977_v56 = vpop.permute.xlu0 %976 }
 0xaf5   :  { %v2204_v32 = vsel %vm980_vm4, %v979_v53, %v977_v56  ;;  %v981_v42 = vsel %vm980_vm4, %v977_v56, %v979_v53 }
 0xaf6   :  { %v1033_v33 = vmul.f32 %v2200_v26, %v2204_v32  ;;  %v1032_v40 = vmul.f32 %v2211_v8, %v981_v42  ;;  %v1020_v23 = vmul.f32 %v2264_v13, %v2204_v32  ;;  %v1021_v19 = vmul.f32 %v2266_v18, %v981_v42  ;;  %v1674_v32 = vld [vmem:[%s2436_s7] sm:$0xf] }
 0xaf7   :  { %v839_v41 = vpop.xlane.xlu2 %838 }
 0xaf8   :  { %v840_v36 = vmul.f32 0.00390625, %v839_v41  ;;  %1064 = vmatpush.msrb.mxu0 %v1033_v33  ;;  %v1648_v33 = vld [vmem:[%s2431_s2 + $0x2] ss:$0 sm:$0xff] }
 0xafa   :  { %v843_v43 = vmul.f32 %v1588_v35, %v840_v36 }
 0xafc   :  { %v970_v44 = vpop.permute.xlu0 %969  ;;  %864 = vmatpush.msrb.mxu3 %v843_v43  ;;  %v963_v50 = vpop.permute.xlu1 %962 }
 0xafd   :  { %1590 = vmatmul.msk.f32.vlgmr.msrb.gmra.mxu3 %vm84_vm0, %v1823_v7  ;;  %v2230_v7 = vld [vmem:[#allocation2 + $0xf0] sm:$0xff] }
 0xafe   :  { %1044 = vmatpush.msra.mxu3 %v1032_v40 }
 0xaff   :  { %v972_v49 = vpop.permute.xlu2 %971 }
 0xb00   :  { %v974_v46 = vsel %vm973_vm6, %v970_v44, %v972_v49  ;;  %v975_v47 = vsel %vm973_vm6, %v972_v49, %v970_v44 }
 0xb01   :  { %v1030_v51 = vmul.f32 %v2219_v45, %v974_v46  ;;  %v1031_v52 = vmul.f32 %v2221_v48, %v975_v47  ;;  %v1018_v24 = vmul.f32 %v2274_v17, %v975_v47  ;;  %v1019_v25 = vmul.f32 %v2276_v22, %v974_v46 }
 0xb03   :  { %1045 = vmatpush.msra.mxu3 %v1030_v51  ;;  %1065 = vmatpush.msrb.mxu0 %v1031_v52 }
 0xb04   :  { %v965_v58 = vpop.permute.xlu0 %964  ;;  %v991_v55 = vpop.permute.xlu1 %990 }
 0xb05   :  { %v967_v60 = vsel %vm966_vm8, %v963_v50, %v965_v58  ;;  %v968_v61 = vsel %vm966_vm8, %v965_v58, %v963_v50 }
 0xb06   :  { %v1028_v5 = vmul.f32 %v2230_v7, %v967_v60  ;;  %v1029_v54 = vmul.f32 %v2232_v57, %v968_v61  ;;  %v1016_v53 = vmul.f32 %v2281_v20, %v968_v61  ;;  %v1017_v56 = vmul.f32 %v2283_v21, %v967_v60  ;;  %v1595_v61 = vld [vmem:[%s2432_s3 + $0x28] sm:$0xff] }
 0xb07   :  { %932 = vmatpush.msra.mxu1 %v1595_v61 }
 0xb08   :  { %1046 = vmatpush.msra.mxu3 %v1028_v5  ;;  %1066 = vmatpush.msrb.mxu0 %v1029_v54  ;;  %v1594_v5 = vld [vmem:[%s2432_s3 + $0x20] sm:$0xff] }
 0xb09   :  { %933 = vmatpush.msra.mxu1 %v1594_v5 }
 0xb0c   :  { %v993_v0 = vpop.permute.xlu0 %992  ;;  %v984_v63 = vpop.permute.xlu1 %983 }
 0xb0d   :  { %v995_v1 = vsel %vm994_vm9, %v991_v55, %v993_v0  ;;  %v996_v3 = vsel %vm994_vm9, %v993_v0, %v991_v55 }
 0xb0e   :  { %v1026_v12 = vmul.f32 %v2241_v6, %v995_v1  ;;  %v1027_v28 = vmul.f32 %v2243_v2, %v996_v3 }
 0xb10   :  { %1047 = vmatpush.msra.mxu3 %v1026_v12  ;;  %1067 = vmatpush.msrb.mxu0 %v1027_v28 }
 0xb12   :  { %1048 = vmatpush.msra.mxu3 %v1024_v29  ;;  %1068 = vmatpush.msrb.mxu0 %v1025_v14 }
 0xb14   :  { %v986_v4 = vpop.permute.xlu0 %985 }
 0xb15   :  { %v988_v9 = vsel %vm987_vm10, %v984_v63, %v986_v4  ;;  %v989_v10 = vsel %vm987_vm10, %v986_v4, %v984_v63 }
 0xb16   :  { %v1022_v15 = vmul.f32 %v2260_v30, %v989_v10  ;;  %v1023_v16 = vmul.f32 %v2262_v34, %v988_v9 }
 0xb18   :  { %1049 = vmatpush.msra.mxu3 %v1022_v15  ;;  %1069 = vmatpush.msrb.mxu0 %v1023_v16  ;;  %v1675_v16 = vld [vmem:[%s2438_s9 + $0x20] sm:$0xf] }
 0xb1a   :  { %1050 = vmatpush.msra.mxu3 %v1020_v23  ;;  %1070 = vmatpush.msrb.mxu0 %v1021_v19  ;;  %v1676_v23 = vld [vmem:[%s2438_s9 + $0x18] sm:$0xff]  ;;  %v1677_v19 = vld [vmem:[%s2438_s9 + $0x10] sm:$0xff] }
 0xb1c   :  { %1051 = vmatpush.msra.mxu3 %v1018_v24  ;;  %1071 = vmatpush.msrb.mxu0 %v1019_v25  ;;  %v1679_v24 = vld [vmem:[%s2438_s9] sm:$0xff] }
 0xb1e   :  { %1052 = vmatpush.msra.mxu3 %v1016_v53  ;;  %1072 = vmatpush.msrb.mxu0 %v1017_v56 }
 0xb20   :  { %1611 = vmatpush.msk.msrb.mxu3 %vm131_vm1, %v1674_v32 }
 0xb80   :  { %v866_v35 = vpop.f32.mrf.mxu3 }
 0xb81   :  { %v867_v41 = vadd.f32 %v1648_v33, %v866_v35 }
 0xb83   :  { %v1591_v36 = vmul.f32 -1.442695, %v867_v41 }
 0xb85   :  { %1662 = vpow2.f32 %v1591_v36 }
 0xb8b   :  { %v1663_v42 = vpop.eup %1662 }
 0xb8c   :  { %v872_v43 = vadd.f32 1.0, %v1663_v42 }
 0xb8e   :  { %1664 = vrcp.f32 %v872_v43  ;;  %v884_v50 = vand.u32 2147483648, %v872_v43  ;;  %v882_v47 = vand.u32 2147483647, %v872_v43  ;;  %vm878_vm12 = vweird.f32 %v872_v43 }
 0xb90   :  { %v885_v52 = vor.u32 1.1754944e-38, %v884_v50  ;;  %vm883_vm15 = vcmp.eq.f32.partialorder %v882_v47, 8.507059e+37 }
 0xb94   :  { %v1665_v40 = vpop.eup %1664 }
 0xb95   :  { %v874_v44 = vmul.f32 %v1665_v40, %v872_v43  ;;  %vm879_vm11 = vweird.f32 %v1665_v40  ;;  %v1187_v43 = vpop.permute.xlu0 %1186 }
 0xb96   :  { %vm880_vm14 = vmor %vm878_vm12, %vm879_vm11 }
 0xb97   :  { %v875_v49 = vsub.f32 1.0, %v874_v44 }
 0xb99   :  { %v876_v46 = vmul.f32 %v1665_v40, %v875_v49 }
 0xb9b   :  { %v877_v51 = vadd.f32 %v1665_v40, %v876_v46 }
 0xb9d   :  { %v881_v58 = vsel %vm880_vm14, %v1665_v40, %v877_v51 }
 0xb9e   :  { %v886_v60 = vsel %vm883_vm15, %v885_v52, %v881_v58  ;;  %v1196_v58 = vpop.permute.xlu0 %1195 }
 0xb9f   :  { %1593 = vmatmul.msk.f32.vlgmr.msra.gmra.mxu0 %vm127_vm5, %v886_v60 }
 0xc1c   :  { %v908_v54 = vpop.f32.mrf.mxu0 }
 0xc1d   :  { %v911_v55 = vmul.f32 %v908_v54, %v1896_v31 }
 0xc1f   :  { %1596 = vmatmul.msk.f32.vlgmr.msra.gmra.mxu1 %vm158_vm7, %v911_v55 }
 0xc9c   :  { %v935_v0 = vpop.f32.mrf.mxu1 }
 0xc9d   :  { %1598 = vmatmul.msk.f32.vlgmr.msrb.gmra.mxu2 %vm182_vm13, %v935_v0 }
 0xd20   :  { %v958_v1 = vpop.f32.mrf.mxu2 }
 0xd21   :  { %v961_v3 = vmul.f32 %v958_v1, %v2018_v59 }
 0xd23   :  { %1599 = vmatmul.msk.f32.vlgmr.msra.gmra.mxu3 %vm2447_vm2, %v961_v3  ;;  %1600 = vmatmul.msk.f32.vlgmr.msrb.gmra.mxu0 %vm2448_vm3, %v961_v3 }
 0xda0   :  { %v1074_v28 = vpop.f32.mrf.mxu0 }
 0xda6   :  { %v1054_v12 = vpop.f32.mrf.mxu3 }
 0xda7   :  { %1092 = vmatpush.msrb.mxu1 %v1054_v12 }
 0xda8   :  { %1601 = vmatmul.msk.f32.vlgmr.msrb.gmra.mxu1 %vm84_vm0, %v2026_v62 }
 0xda9   :  { %1112 = vmatpush.msra.mxu1 %v1074_v28 }
 0xdb0   :  { %1602 = vmatmul.msk.f32.vlgmr.msra.gmra.mxu1 %vm84_vm0, %v2026_v62 }
 0xe25   :  { %v1094_v31 = vpop.f32.mrf.mxu1 }
 0xe2d   :  { %v1114_v29 = vpop.f32.mrf.mxu1 }
 0xe2e   :  { %v1117_v14 = vadd.f32 %v1114_v29, %v1094_v31 }
 0xe30   :  { %1118 = vadd.xlane.f32.xlu2 %v1117_v14 }
 0xea3   :  { %v1119_v63 = vpop.xlane.xlu2 %1118 }
 0xea4   :  { %v1120_v59 = vmul.f32 0.001953125, %v1119_v63 }
 0xea6   :  { %v1121_v4 = vsub.f32 %v1054_v12, %v1120_v59  ;;  %v1122_v9 = vsub.f32 %v1074_v28, %v1120_v59  ;;  %v1607_v28 = vld [vmem:[%s2430_s1 + $0x18] sm:$0xff] }
 0xea8   :  { %v1123_v10 = vmul.f32 %v1121_v4, %v1121_v4  ;;  %v1124_v15 = vmul.f32 %v1122_v9, %v1122_v9 }
 0xeaa   :  { %1140 = vmatpush.msra.mxu2 %v1123_v10  ;;  %1160 = vmatpush.msrb.mxu1 %v1124_v15 }
 0xeab   :  { %1603 = vmatmul.msk.f32.vlgmr.msra.gmra.mxu2 %vm84_vm0, %v2026_v62  ;;  %1604 = vmatmul.msk.f32.vlgmr.msrb.gmra.mxu1 %vm84_vm0, %v2026_v62  ;;  %v1678_v62 = vld [vmem:[%s2438_s9 + $0x8] sm:$0xff] }
 0xeac   :  { %1616 = vmatpush.msk.msra.mxu1 %vm131_vm1, %v1675_v16 }
 0xeae   :  { %1318 = vmatpush.msra.mxu1 %v1676_v23 }
 0xeb0   :  { %1319 = vmatpush.msra.mxu1 %v1677_v19 }
 0xeb2   :  { %1320 = vmatpush.msra.mxu1 %v1678_v62 }
 0xeb4   :  { %1321 = vmatpush.msra.mxu1 %v1679_v24 }
 0xf28   :  { %v1162_v25 = vpop.f32.mrf.mxu1 }
 0xf2e   :  { %v1142_v53 = vpop.f32.mrf.mxu2 }
 0xf2f   :  { %v1165_v56 = vadd.f32 %v1162_v25, %v1142_v53 }
 0xf31   :  { %1166 = vadd.xlane.f32.xlu1 %v1165_v56 }
 0xfa4   :  { %v1167_v32 = vpop.xlane.xlu1 %1166 }
 0xfa5   :  { %v1168_v33 = vmul.f32 0.001953125, %v1167_v32 }
 0xfa7   :  { %v1169_v35 = vadd.f32 1e-05, %v1168_v33 }
 0xfa9   :  { %1666 = vrsqrt.f32 %v1169_v35  ;;  %vm1176_vm11 = vweird.f32 %v1169_v35 }
 0xfaf   :  { %v1667_v41 = vpop.eup %1666 }
 0xfb0   :  { %v1171_v36 = vmul.f32 %v1667_v41, %v1169_v35  ;;  %vm1177_vm1 = vweird.f32 %v1667_v41 }
 0xfb1   :  { %vm1178_vm12 = vmor %vm1176_vm11, %vm1177_vm1 }
 0xfb2   :  { %v1172_v42 = vmul.f32 %v1667_v41, %v1171_v36 }
 0xfb4   :  { %v1173_v40 = vmul.f32 0.5, %v1172_v42 }
 0xfb6   :  { %v1174_v44 = vsub.f32 1.5, %v1173_v40 }
 0xfb8   :  { %v1175_v49 = vmul.f32 %v1667_v41, %v1174_v44 }
 0xfba   :  { %v1179_v50 = vsel %vm1178_vm12, %v1667_v41, %v1175_v49 }
 0xfbb   :  { %v1180_v46 = vmul.f32 %v1179_v50, %v1121_v4  ;;  %v1181_v47 = vmul.f32 %v1179_v50, %v1122_v9  ;;  %v1680_v9 = vld [vmem:[%s2435_s6] sm:$0xff] }
 0xfbd   :  { %v1189_v51 = vmul.f32 %v1187_v43, %v1180_v46  ;;  %v1190_v52 = vmul.f32 %v1187_v43, %v1181_v47 }
 0xfbf   :  { %v1198_v60 = vadd.f32 %v1196_v58, %v1189_v51  ;;  %v1199_v61 = vadd.f32 %v1196_v58, %v1190_v52 }
 0xfc1   :  { %v1200_v5 = vmax.f32 %v1198_v60, 0.0  ;;  %v1201_v54 = vmax.f32 %v1199_v61, 0.0 }
 0xfc3   :  { %1341 = vrot.lane.b32.xlu1 %v1201_v54, %s1722_s28  ;;  %1339 = vrot.lane.b32.xlu2 %v1200_v5, %s1722_s28  ;;  %v1202_v55 = vadd.f32 %v1201_v54, %v1200_v5  ;;  %v1365_v42 = vmul.f32 %v1200_v5, %v2249_v11  ;;  %v1366_v43 = vmul.f32 %v1201_v54, %v2251_v27 }
 0xfc5   :  { %1203 = vadd.xlane.f32.xlu0 %v1202_v55 }
 0xfcb   :  { %1327 = vrot.lane.b32.xlu1 %v1200_v5, %s1723_s21  ;;  %1335 = vrot.lane.b32.xlu2 %v1201_v54, %s1724_s30 }
 0xfd3   :  { %1351 = vrot.lane.b32.xlu1 %v1200_v5, %s1725_s15  ;;  %1329 = vrot.lane.b32.xlu2 %v1201_v54, %s1723_s21 }
 0xfd9   :  { %1333 = vrot.lane.b32.xlu0 %v1200_v5, %s1724_s30 }
 0xfdb   :  { %1347 = vrot.lane.b32.xlu1 %v1201_v54, %s1726_s16  ;;  %1353 = vrot.lane.b32.xlu2 %v1201_v54, %s1725_s15  ;;  %v1613_v54 = vld [vmem:[%s2432_s3 + $0x30] sm:$0xff] }
 0xfe1   :  { %1345 = vrot.lane.b32.xlu0 %v1200_v5, %s1726_s16  ;;  %v1614_v5 = vld [vmem:[%s2432_s3 + $0x38] sm:$0xff] }
 0xfe2   :  { %1297 = vmatpush.msra.mxu0 %v1614_v5 }
 0xfe4   :  { %1298 = vmatpush.msra.mxu0 %v1613_v54 }
0x101d   :  { %v1340_v0 = vpop.permute.xlu2 %1339 }
0x1025   :  { %v1336_v29 = vpop.permute.xlu2 %1335 }
0x102d   :  { %v1330_v10 = vpop.permute.xlu2 %1329 }
0x1035   :  { %v1342_v1 = vpop.permute.xlu1 %1341  ;;  %v1354_v24 = vpop.permute.xlu2 %1353 }
0x1036   :  { %v1344_v3 = vsel %vm980_vm4, %v1342_v1, %v1340_v0  ;;  %v1343_v63 = vsel %vm980_vm4, %v1340_v0, %v1342_v1  ;;  %v1681_v0 = vld [vmem:[%s2437_s8] sm:$0xff] }
0x1037   :  { %v1374_v12 = vmul.f32 %v1344_v3, %v2200_v26  ;;  %v1373_v4 = vmul.f32 %v1343_v63, %v2211_v8  ;;  %v1361_v40 = vmul.f32 %v1344_v3, %v2264_v13  ;;  %v1362_v44 = vmul.f32 %v1343_v63, %v2266_v18 }
0x1038   :  { %v1204_v31 = vpop.xlane.xlu0 %1203 }
0x1039   :  { %v1205_v14 = vmul.f32 0.00390625, %v1204_v31  ;;  %1405 = vmatpush.msra.mxu3 %v1374_v12 }
0x103b   :  { %v1208_v59 = vmul.f32 %v1607_v28, %v1205_v14  ;;  %v1682_v28 = vld [vmem:[%s2439_s10] sm:$0xff] }
0x103d   :  { %1229 = vmatpush.msrb.mxu2 %v1208_v59  ;;  %v1328_v26 = vpop.permute.xlu1 %1327 }
0x103e   :  { %1609 = vmatmul.msk.f32.vlgmr.msrb.gmra.mxu2 %vm84_vm0, %v1680_v9  ;;  %v1331_v23 = vsel %vm966_vm8, %v1328_v26, %v1330_v10  ;;  %v1332_v19 = vsel %vm966_vm8, %v1330_v10, %v1328_v26 }
0x103f   :  { %1385 = vmatpush.msra.mxu2 %v1373_v4  ;;  %v1369_v33 = vmul.f32 %v1331_v23, %v2230_v7  ;;  %v1370_v35 = vmul.f32 %v1332_v19, %v2232_v57  ;;  %v1357_v38 = vmul.f32 %v1332_v19, %v2281_v20  ;;  %v1683_v4 = vld [vmem:[%s2440_s11] sm:$0xff] }
0x1045   :  { %v1352_v15 = vpop.permute.xlu1 %1351 }
0x1046   :  { %v1355_v56 = vsel %vm994_vm9, %v1352_v15, %v1354_v24  ;;  %v1356_v32 = vsel %vm994_vm9, %v1354_v24, %v1352_v15 }
0x1047   :  { %v1367_v41 = vmul.f32 %v1355_v56, %v2241_v6  ;;  %v1368_v36 = vmul.f32 %v1356_v32, %v2243_v2 }
0x104b   :  { %v1334_v16 = vpop.permute.xlu0 %1333 }
0x104c   :  { %v1337_v8 = vsel %vm973_vm6, %v1334_v16, %v1336_v29  ;;  %v1338_v62 = vsel %vm973_vm6, %v1336_v29, %v1334_v16 }
0x104d   :  { %v1371_v25 = vmul.f32 %v1337_v8, %v2219_v45  ;;  %v1372_v53 = vmul.f32 %v1338_v62, %v2221_v48  ;;  %v1348_v45 = vpop.permute.xlu1 %1347  ;;  %v1359_v11 = vmul.f32 %v1338_v62, %v2274_v17  ;;  %v1360_v27 = vmul.f32 %v1337_v8, %v2276_v22  ;;  %v1624_v8 = vld [vmem:[%s2433_s4 + $0x18] sm:$0xff] }
0x104e   :  { %1529 = vperm.xlu1 %1645, %v1624_v8   ;;  %v1625_v62 = vld [vmem:[%s2434_s5 + $0x18] sm:$0xff] }
0x104f   :  { %1386 = vmatpush.msra.mxu2 %v1371_v25  ;;  %1406 = vmatpush.msra.mxu3 %v1372_v53 }
0x1051   :  { %1387 = vmatpush.msra.mxu2 %v1369_v33  ;;  %1407 = vmatpush.msra.mxu3 %v1370_v35 }
0x1053   :  { %1388 = vmatpush.msra.mxu2 %v1367_v41  ;;  %1408 = vmatpush.msra.mxu3 %v1368_v36  ;;  %v1346_v48 = vpop.permute.xlu0 %1345 }
0x1054   :  { %v1349_v7 = vsel %vm987_vm10, %v1346_v48, %v1348_v45  ;;  %v1350_v57 = vsel %vm987_vm10, %v1348_v45, %v1346_v48  ;;  %vm2450_vm10 = vmmov %vm2447_vm2 }
0x1055   :  { %v1363_v6 = vmul.f32 %v1350_v57, %v2260_v30  ;;  %v1364_v2 = vmul.f32 %v1349_v7, %v2262_v34  ;;  %1389 = vmatpush.msra.mxu2 %v1365_v42  ;;  %1409 = vmatpush.msra.mxu3 %v1366_v43  ;;  %v1358_v30 = vmul.f32 %v1331_v23, %v2283_v21  ;;  %v1649_v34 = vld [vmem:[%s2431_s2 + $0x3] ss:$0 sm:$0xff] }
0x1056   :  { %1538 = vperm.xlu1 %1645, %v1625_v62  }
0x1057   :  { %1390 = vmatpush.msra.mxu2 %v1363_v6  ;;  %1410 = vmatpush.msra.mxu3 %v1364_v2 }
0x1059   :  { %1391 = vmatpush.msra.mxu2 %v1361_v40  ;;  %1411 = vmatpush.msra.mxu3 %v1362_v44 }
0x105b   :  { %1392 = vmatpush.msra.mxu2 %v1359_v11  ;;  %1412 = vmatpush.msra.mxu3 %v1360_v27 }
0x105d   :  { %1393 = vmatpush.msra.mxu2 %v1357_v38  ;;  %1413 = vmatpush.msra.mxu3 %v1358_v30 }
0x10c0   :  { %v1530_v48 = vpop.permute.xlu1 %1529 }
0x10c1   :  { %v1231_v13 = vpop.f32.mrf.mxu2 }
0x10c2   :  { %v1232_v18 = vadd.f32 %v1649_v34, %v1231_v13 }
0x10c4   :  { %v1610_v49 = vmul.f32 -1.442695, %v1232_v18 }
0x10c6   :  { %1668 = vpow2.f32 %v1610_v49 }
0x10c8   :  { %v1539_v44 = vpop.permute.xlu1 %1538 }
0x10cc   :  { %v1669_v17 = vpop.eup %1668 }
0x10cd   :  { %v1237_v22 = vadd.f32 1.0, %v1669_v17 }
0x10cf   :  { %1670 = vrcp.f32 %v1237_v22  ;;  %v1249_v47 = vand.u32 2147483648, %v1237_v22  ;;  %v1247_v51 = vand.u32 2147483647, %v1237_v22  ;;  %vm1243_vm6 = vweird.f32 %v1237_v22 }
0x10d1   :  { %v1250_v58 = vor.u32 1.1754944e-38, %v1249_v47  ;;  %vm1248_vm9 = vcmp.eq.f32.partialorder %v1247_v51, 8.507059e+37 }
0x10d5   :  { %v1671_v50 = vpop.eup %1670 }
0x10d6   :  { %v1239_v46 = vmul.f32 %v1671_v50, %v1237_v22  ;;  %vm1244_vm4 = vweird.f32 %v1671_v50 }
0x10d7   :  { %vm1245_vm8 = vmor %vm1243_vm6, %vm1244_vm4 }
0x10d8   :  { %v1240_v20 = vsub.f32 1.0, %v1239_v46 }
0x10da   :  { %v1241_v21 = vmul.f32 %v1671_v50, %v1240_v20 }
0x10dc   :  { %v1242_v52 = vadd.f32 %v1671_v50, %v1241_v21 }
0x10de   :  { %v1246_v60 = vsel %vm1245_vm8, %v1671_v50, %v1242_v52 }
0x10df   :  { %v1251_v61 = vsel %vm1248_vm9, %v1250_v58, %v1246_v60 }
0x10e0   :  { %1612 = vmatmul.msk.f32.vlgmr.msrb.gmra.mxu3 %vm127_vm5, %v1251_v61  ;;  %vm2449_vm5 = vmmov %vm2447_vm2 }
0x1163   :  { %v1273_v55 = vpop.f32.mrf.mxu3 }
0x1164   :  { %v1276_v1 = vmul.f32 %v1681_v0, %v1273_v55 }
0x1166   :  { %1615 = vmatmul.msk.f32.vlgmr.msra.gmra.mxu0 %vm158_vm7, %v1276_v1 }
0x11e3   :  { %v1300_v3 = vpop.f32.mrf.mxu0 }
0x11e4   :  { %1617 = vmatmul.msk.f32.vlgmr.msra.gmra.mxu1 %vm182_vm13, %v1300_v3 }
0x1261   :  { %v1323_v12 = vpop.f32.mrf.mxu1 }
0x1262   :  { %v1326_v31 = vmul.f32 %v1682_v28, %v1323_v12 }
0x1264   :  { %1618 = vmatmul.msk.f32.vlgmr.msra.gmra.mxu2 %vm2449_vm5, %v1326_v31  ;;  %1619 = vmatmul.msk.f32.vlgmr.msra.gmra.mxu3 %vm2450_vm10, %v1326_v31 }
0x12e7   :  { %v1395_v29 = vpop.f32.mrf.mxu2  ;;  %v1415_v14 = vpop.f32.mrf.mxu3 }
0x12e8   :  { %v1418_v63 = vadd.f32 %v1395_v29, %v2159_v37  ;;  %v1419_v59 = vadd.f32 %v1415_v14, %v2161_v39 }
0x12ea   :  { %1435 = vmatpush.msrb.mxu0 %v1418_v63 }
0x12eb   :  { %1620 = vmatmul.msk.f32.vlgmr.msrb.gmra.mxu0 %vm84_vm0, %v1683_v4 }
0x12ec   :  { %1455 = vmatpush.msra.mxu0 %v1419_v59 }
0x12f3   :  { %1621 = vmatmul.msk.f32.vlgmr.msra.gmra.mxu0 %vm84_vm0, %v1683_v4 }
0x1368   :  { %v1437_v9 = vpop.f32.mrf.mxu0 }
0x1370   :  { %v1457_v26 = vpop.f32.mrf.mxu0 }
0x1371   :  { %v1460_v10 = vadd.f32 %v1457_v26, %v1437_v9 }
0x1373   :  { %1461 = vadd.xlane.f32.xlu2 %v1460_v10 }
0x13e6   :  { %v1462_v15 = vpop.xlane.xlu2 %1461 }
0x13e7   :  { %v1463_v16 = vmul.f32 0.001953125, %v1462_v15 }
0x13e9   :  { %v1464_v23 = vsub.f32 %v1418_v63, %v1463_v16  ;;  %v1465_v37 = vsub.f32 %v1419_v59, %v1463_v16 }
0x13eb   :  { %v1466_v19 = vmul.f32 %v1464_v23, %v1464_v23  ;;  %v1467_v39 = vmul.f32 %v1465_v37, %v1465_v37 }
0x13ed   :  { %1483 = vmatpush.msrb.mxu1 %v1466_v19  ;;  %1503 = vmatpush.msrb.mxu0 %v1467_v39 }
0x13ee   :  { %1622 = vmatmul.msk.f32.vlgmr.msrb.gmra.mxu1 %vm84_vm0, %v1683_v4  ;;  %1623 = vmatmul.msk.f32.vlgmr.msrb.gmra.mxu0 %vm84_vm0, %v1683_v4 }
0x146b   :  { %v1485_v24 = vpop.f32.mrf.mxu1  ;;  %v1505_v25 = vpop.f32.mrf.mxu0 }
0x146c   :  { %v1508_v53 = vadd.f32 %v1505_v25, %v1485_v24 }
0x146e   :  { %1509 = vadd.xlane.f32.xlu0 %v1508_v53 }
0x14e1   :  { %v1510_v56 = vpop.xlane.xlu0 %1509 }
0x14e2   :  { %v1511_v32 = vmul.f32 0.001953125, %v1510_v56 }
0x14e4   :  { %v1512_v33 = vadd.f32 1e-05, %v1511_v32 }
0x14e6   :  { %1672 = vrsqrt.f32 %v1512_v33  ;;  %vm1519_vm7 = vweird.f32 %v1512_v33 }
0x14ec   :  { %v1673_v35 = vpop.eup %1672 }
0x14ed   :  { %v1514_v41 = vmul.f32 %v1673_v35, %v1512_v33  ;;  %vm1520_vm0 = vweird.f32 %v1673_v35 }
0x14ee   :  { %vm1521_vm13 = vmor %vm1519_vm7, %vm1520_vm0 }
0x14ef   :  { %v1515_v36 = vmul.f32 %v1673_v35, %v1514_v41 }
0x14f1   :  { %v1516_v45 = vmul.f32 0.5, %v1515_v36 }
0x14f3   :  { %v1517_v42 = vsub.f32 1.5, %v1516_v45 }
0x14f5   :  { %v1518_v43 = vmul.f32 %v1673_v35, %v1517_v42 }
0x14f7   :  { %v1522_v7 = vsel %vm1521_vm13, %v1673_v35, %v1518_v43 }
0x14f8   :  { %v1523_v57 = vmul.f32 %v1522_v7, %v1464_v23  ;;  %v1524_v6 = vmul.f32 %v1522_v7, %v1465_v37 }
0x14fa   :  { %v1532_v2 = vmul.f32 %v1530_v48, %v1523_v57  ;;  %v1533_v40 = vmul.f32 %v1530_v48, %v1524_v6 }
0x14fc   :  { %v1541_v11 = vadd.f32 %v1539_v44, %v1532_v2  ;;  %v1542_v27 = vadd.f32 %v1539_v44, %v1533_v40 }
0x14fe   :  { %v1543_v38 = vmax.f32 %v1541_v11, 0.0  ;;  %v1544_v30 = vmax.f32 %v1542_v27, 0.0 }
0x1500   :  { %1545 = vst [vmem:[%s2443_s14] sm:$0xff] %v1543_v38 }
0x1501   :  { %1546 = vst [vmem:[%s2443_s14 + $0x8] sm:$0xff] %v1544_v30 }
0x1502   :  { %1555 = vsyncpa [#allocation3], 1 }

</bundles_post_ra>
